<compile_context>
chip_gen: v7x
topology: tpu7x:2x2x1
jax: 0.10.0
libtpu: 0.0.40
codegen_flags: <defaults>
</compile_context>

<pallas_src>
import jax
import jax.numpy as jnp
from jax import lax
from jax.experimental import pallas as pl
from jax.experimental.pallas import tpu as pltpu

# ----------------------------- model dims -----------------------------------
B = 2            # batch
S = 8            # sequence length (real module uses 256)
H = 32           # hidden size (real roberta-base: 768)
NH = 2           # attention heads
DH = H // NH     # head dim
FFN = 64         # feed-forward dim
LAYERS = 2       # encoder layers
VOCAB = 128      # == MXU lane width, so the one-hot matmul is lane-dense
MAX_POS = 16
NUM_LABELS = 8   # implied by pre_classifier = Linear(8, 768)
PRE_H = 768      # pre_classifier output dim (kept at real size)

# packed-buffer row layout --------------------------------------------------
EMB_ROWS = 144                       # 128 word + 8 pos + type + ln_g + ln_b (+pad)
ROW_POS = VOCAB                      # 128
ROW_TYPE = VOCAB + S                 # 136
ROW_EMB_G = ROW_TYPE + 1             # 137
ROW_EMB_B = ROW_TYPE + 2             # 138

FFN_ROWS = 104                       # 32 (w1) + 64 (w2) + 7 vec rows (+pad)
ROW_BO = H + FFN                     # 96
ROW_LN1G, ROW_LN1B = 97, 98
ROW_B1, ROW_B2 = 99, 100
ROW_LN2G, ROW_LN2B = 101, 102

HEAD_ROWS = 40                       # 32 weight rows + 3 bias rows (+pad)
HEAD_LANES = PRE_H + H               # 800: [fused_w | cls_dense_w] (128-aligned split)

_VMEM = pl.BlockSpec(memory_space=pltpu.MemorySpace.VMEM)


# ----------------------------- fused kernel ----------------------------------
def _fused_forward_kernel(
    ids_ref, mask_ref, emb_ref, attn_w_ref, attn_b_ref, ffn_ref,
    head_w1_ref, head_w2_ref, out_ref,
):
    f32 = jnp.float32
    inv_h = 1.0 / H

    def layernorm(x, g, b):
        # sum * const instead of mean: no VPU divides on the critical path.
        mu = jnp.sum(x, axis=-1, keepdims=True) * inv_h
        xc = x - mu
        var = jnp.sum(xc * xc, axis=-1, keepdims=True) * inv_h
        return xc * lax.rsqrt(var + 1e-5) * g + b

    def gelu(y):
        # TODO(synk): HF RoBERTa uses exact (erf) GELU; tanh approximation
        # differs at the ~1e-3 level (irrelevant for synthetic weights).
        return 0.5 * y * (1.0 + jnp.tanh(0.7978845608028654
                                         * (y + 0.044715 * y * y * y)))

    # ---- fused embedding: one-hot (BS,128) @ word_emb(128,H) --------------
    ids = ids_ref[...]                                                 # (BS, 1) i32
    iota = lax.broadcasted_iota(jnp.int32, (B * S, VOCAB), 1)
    onehot = (iota == ids).astype(f32)                                 # (BS, 128)
    x = jnp.dot(onehot, emb_ref[0:VOCAB, :], preferred_element_type=f32)

    pos = emb_ref[ROW_POS:ROW_POS + S, :]                              # (S, H)
    type_row = emb_ref[ROW_TYPE:ROW_TYPE + 1, :]                       # (1, H)
    # TODO(synk): RoBERTa type_vocab_size == 1, so token_type_ids (all zeros)
    # always select row 0; position ids use 0..S-1 (real RoBERTa offsets by
    # padding_idx+1 — fine for synthetic weights).
    x = (x.reshape(B, S, H) + pos[None, :, :]).reshape(B * S, H) + type_row
    x = layernorm(x, emb_ref[ROW_EMB_G:ROW_EMB_G + 1, :],
                  emb_ref[ROW_EMB_B:ROW_EMB_B + 1, :])                 # (BS, H)

    # ---- additive attention-mask bias built on-chip: (B, 1, S) ------------
    bias = ((1.0 - mask_ref[...]) * -1e9)[:, None, :]

    for i in range(LAYERS):
        # Per-head projections from head-major weight slabs: every q/k/v/ctx
        # tensor is produced at lane offset 0 (no lane shuffles).  The
        # 1/sqrt(DH) score scale is pre-folded into Wq/bq.
        acc = None
        for h in range(NH):
            q = (jnp.dot(x, attn_w_ref[i, h, 0], preferred_element_type=f32)
                 + attn_b_ref[i, h, 0]).reshape(B, S, DH)
            k = (jnp.dot(x, attn_w_ref[i, h, 1], preferred_element_type=f32)
                 + attn_b_ref[i, h, 1]).reshape(B, S, DH)
            v = (jnp.dot(x, attn_w_ref[i, h, 2], preferred_element_type=f32)
                 + attn_b_ref[i, h, 2]).reshape(B, S, DH)

            s = jnp.einsum("bqd,bkd->bqk", q, k,
                           preferred_element_type=f32) + bias          # (B,S,S)
            s = s - jnp.max(s, axis=-1, keepdims=True)
            p = jnp.exp(s)
            p = p * pl.reciprocal(jnp.sum(p, axis=-1, keepdims=True),
                                  approx=False)
            ctx = jnp.einsum("bqk,bkd->bqd", p, v,
                             preferred_element_type=f32).reshape(B * S, DH)

            # concat(ctx_h) @ Wo folded into per-head partials against Wo^T
            # slabs (contraction on the shared last dim -> no concat/relayout).
            contrib = lax.dot_general(
                ctx, attn_w_ref[i, h, 3],
                dimension_numbers=(((1,), (1,)), ((), ())),
                preferred_element_type=f32)                            # (BS, H)
            acc = contrib if acc is None else acc + contrib

        bo = ffn_ref[i, ROW_BO:ROW_BO + 1, 0:H]
        x = layernorm(acc + bo + x,
                      ffn_ref[i, ROW_LN1G:ROW_LN1G + 1, 0:H],
                      ffn_ref[i, ROW_LN1B:ROW_LN1B + 1, 0:H])

        # Feed-forward
        w1 = ffn_ref[i, 0:H, :]                                        # (H, FFN)
        w2 = ffn_ref[i, H:H + FFN, 0:H]                                # (FFN, H)
        ffn = gelu(jnp.dot(x, w1, preferred_element_type=f32)
                   + ffn_ref[i, ROW_B1:ROW_B1 + 1, 0:FFN])
        ffn = (jnp.dot(ffn, w2, preferred_element_type=f32)
               + ffn_ref[i, ROW_B2:ROW_B2 + 1, 0:H])
        x = layernorm(ffn + x,
                      ffn_ref[i, ROW_LN2G:ROW_LN2G + 1, 0:H],
                      ffn_ref[i, ROW_LN2B:ROW_LN2B + 1, 0:H])

    # ---- RobertaClassificationHead on the <s> (first) token ---------------
    cls = x.reshape(B, S, H)[:, 0, :]                                  # (B, H)
    cls_dense_w = head_w1_ref[0:H, PRE_H:PRE_H + H]                    # (H, H)
    cls_db = head_w1_ref[H + 1:H + 2, 0:H]                             # (1, H)
    cls = jnp.tanh(jnp.dot(cls, cls_dense_w, preferred_element_type=f32) + cls_db)

    # cls_out_proj (H,8) and pre_classifier (8,768) folded at init into one
    # (H,768) weight/bias (exact: ReLU is applied after pre_classifier).
    fused_w = head_w1_ref[0:H, 0:PRE_H]                                # (H, 768)
    fused_b = head_w1_ref[H:H + 1, 0:PRE_H]                            # (1, 768)
    pooler = jnp.maximum(
        jnp.dot(cls, fused_w, preferred_element_type=f32) + fused_b, 0.0)
    # TODO(synk): Dropout(0.3) is identity in eval mode (predict() calls self.eval()).
    head_b = head_w1_ref[H + 2:H + 3, 0:NUM_LABELS]                    # (1, 8)
    out = jnp.dot(pooler, head_w2_ref[...], preferred_element_type=f32) + head_b
    out_ref[...] = out.astype(out_ref.dtype)


# ----------------------------- parameters ------------------------------------
def init_params(key):
    keys = iter(jax.random.split(key, 64))

    def dense(fan_in, fan_out):
        kw, kb = jax.random.split(next(keys))
        w = 0.02 * jax.random.normal(kw, (fan_in, fan_out), jnp.float32)
        b = 0.02 * jax.random.normal(kb, (fan_out,), jnp.float32)
        return w, b

    # ---- embeddings packed into one (EMB_ROWS, H) buffer -------------------
    word_emb = 0.02 * jax.random.normal(next(keys), (VOCAB, H), jnp.float32)
    pos_emb = 0.02 * jax.random.normal(next(keys), (MAX_POS, H), jnp.float32)
    type_emb = 0.02 * jax.random.normal(next(keys), (1, H), jnp.float32)

    emb_pack = jnp.zeros((EMB_ROWS, H), jnp.float32)
    emb_pack = emb_pack.at[0:VOCAB].set(word_emb)
    emb_pack = emb_pack.at[ROW_POS:ROW_POS + S].set(pos_emb[:S])
    emb_pack = emb_pack.at[ROW_TYPE].set(type_emb[0])
    emb_pack = emb_pack.at[ROW_EMB_G].set(jnp.ones((H,), jnp.float32))
    emb_pack = emb_pack.at[ROW_EMB_B].set(jnp.zeros((H,), jnp.float32))

    # ---- per-layer attention / FFN weights, head-major packing -------------
    attn_w = jnp.zeros((LAYERS, NH, 4, H, DH), jnp.float32)   # Wq, Wk, Wv, Wo^T
    attn_b = jnp.zeros((LAYERS, NH, 3, 1, DH), jnp.float32)   # bq, bk, bv
    ffn_pack = jnp.zeros((LAYERS, FFN_ROWS, FFN), jnp.float32)
    scale = 1.0 / (DH ** 0.5)

    for i in range(LAYERS):
        wq, bq = dense(H, H)
        wk, bk = dense(H, H)
        wv, bv = dense(H, H)
        wq, bq = wq * scale, bq * scale          # fold attention score scale
        wo, bo = dense(H, H)
        w1, b1 = dense(H, FFN)
        w2, b2 = dense(FFN, H)

        for h in range(NH):
            sl = slice(h * DH, (h + 1) * DH)
            attn_w = attn_w.at[i, h, 0].set(wq[:, sl])
            attn_w = attn_w.at[i, h, 1].set(wk[:, sl])
            attn_w = attn_w.at[i, h, 2].set(wv[:, sl])
            attn_w = attn_w.at[i, h, 3].set(wo[sl, :].T)      # (H, DH)
            attn_b = attn_b.at[i, h, 0, 0].set(bq[sl])
            attn_b = attn_b.at[i, h, 1, 0].set(bk[sl])
            attn_b = attn_b.at[i, h, 2, 0].set(bv[sl])

        ffn_pack = ffn_pack.at[i, 0:H, :].set(w1)
        ffn_pack = ffn_pack.at[i, H:H + FFN, 0:H].set(w2)
        ffn_pack = ffn_pack.at[i, ROW_BO, 0:H].set(bo)
        ffn_pack = ffn_pack.at[i, ROW_LN1G, 0:H].set(jnp.ones((H,), jnp.float32))
        ffn_pack = ffn_pack.at[i, ROW_LN1B, 0:H].set(jnp.zeros((H,), jnp.float32))
        ffn_pack = ffn_pack.at[i, ROW_B1, 0:FFN].set(b1)
        ffn_pack = ffn_pack.at[i, ROW_B2, 0:H].set(b2)
        ffn_pack = ffn_pack.at[i, ROW_LN2G, 0:H].set(jnp.ones((H,), jnp.float32))
        ffn_pack = ffn_pack.at[i, ROW_LN2B, 0:H].set(jnp.zeros((H,), jnp.float32))

    # ---- classification head + module head, with cls_out ∘ pre_classifier
    #      folded into a single (H, 768) linear (exact; ReLU comes after) ----
    cls_dense_w, cls_dense_b = dense(H, H)
    cls_out_w, cls_out_b = dense(H, NUM_LABELS)
    pre_w, pre_b = dense(NUM_LABELS, PRE_H)          # pre_classifier Linear(8, 768)
    head_w, head_b = dense(PRE_H, NUM_LABELS)        # classifier Linear(768, 8)

    fused_w = cls_out_w @ pre_w                      # (H, 768)
    fused_b = cls_out_b @ pre_w + pre_b              # (768,)

    head_w1 = jnp.zeros((HEAD_ROWS, HEAD_LANES), jnp.float32)
    head_w1 = head_w1.at[0:H, 0:PRE_H].set(fused_w)
    head_w1 = head_w1.at[0:H, PRE_H:PRE_H + H].set(cls_dense_w)
    head_w1 = head_w1.at[H, 0:PRE_H].set(fused_b)
    head_w1 = head_w1.at[H + 1, 0:H].set(cls_dense_b)
    head_w1 = head_w1.at[H + 2, 0:NUM_LABELS].set(head_b)

    return {
        "emb_pack": emb_pack,
        "attn_w": attn_w,
        "attn_b": attn_b,
        "ffn_pack": ffn_pack,
        "head_w1": head_w1,
        "head_w2": head_w,
    }


# ----------------------------- forward ---------------------------------------
def forward(params, input_ids, attention_mask, token_type_ids):
    del token_type_ids  # type_vocab_size == 1: row 0 is added inside the kernel
    b, s = input_ids.shape
    ids = input_ids.reshape(b * s, 1).astype(jnp.int32)
    mask = attention_mask.astype(jnp.float32)

    args = (
        ids, mask,
        params["emb_pack"], params["attn_w"], params["attn_b"],
        params["ffn_pack"], params["head_w1"], params["head_w2"],
    )
    out = pl.pallas_call(
        _fused_forward_kernel,
        out_shape=jax.ShapeDtypeStruct((b, NUM_LABELS), jnp.float32),
        in_specs=[_VMEM] * len(args),
        out_specs=_VMEM,
    )(*args)
    return out.reshape(-1, NUM_LABELS)


# ----------------------------- main -------------------------------------------
if __name__ == "__main__":
    key = jax.random.PRNGKey(0)
    k_param, k_ids = jax.random.split(key)
    params = init_params(k_param)

    input_ids = jax.random.randint(k_ids, (B, S), 0, VOCAB, dtype=jnp.int32)
    attention_mask = jnp.ones((B, S), dtype=jnp.int32)
    token_type_ids = jnp.zeros((B, S), dtype=jnp.int32)

    out = jax.jit(forward)(params, input_ids, attention_mask, token_type_ids)
    out = jax.block_until_ready(out)
    assert out.shape == (B, NUM_LABELS) and out.dtype == jnp.float32
    assert bool(jnp.all(jnp.isfinite(out)))
    print("KERNEL_OK")
</pallas_src>

<mosaic_0001>
module attributes {stable_mosaic.version = 11 : i64} {
  func.func @_fused_forward_kernel(%arg0: memref<16x1xi32, #tpu.memory_space<vmem>>, %arg1: memref<2x8xf32, #tpu.memory_space<vmem>>, %arg2: memref<144x32xf32, #tpu.memory_space<vmem>>, %arg3: memref<2x2x4x32x16xf32, #tpu.memory_space<vmem>>, %arg4: memref<2x2x3x1x16xf32, #tpu.memory_space<vmem>>, %arg5: memref<2x104x64xf32, #tpu.memory_space<vmem>>, %arg6: memref<40x800xf32, #tpu.memory_space<vmem>>, %arg7: memref<768x8xf32, #tpu.memory_space<vmem>>, %arg8: memref<2x8xf32, #tpu.memory_space<vmem>>) attributes {dimension_semantics = [], scalar_prefetch = 0 : i64, scratch_operands = 0 : i64, tpu.core_type = #tpu.core_type<tc>} {
    %c0 = arith.constant 0 : index
    %c0_0 = arith.constant 0 : index
    %0 = vector.load %arg0[%c0, %c0_0] : memref<16x1xi32, #tpu.memory_space<vmem>>, vector<16x1xi32>
    %1 = tpu.iota {dimensions = array<i32: 1>} : vector<16x128xi32>
    %2 = vector.broadcast %0 : vector<16x1xi32> to vector<16x128xi32>
    %3 = arith.cmpi eq, %1, %2 : vector<16x128xi32>
    %4 = arith.extui %3 : vector<16x128xi1> to vector<16x128xi32>
    %5 = arith.sitofp %4 : vector<16x128xi32> to vector<16x128xf32>
    %c0_1 = arith.constant 0 : index
    %c0_2 = arith.constant 0 : index
    %6 = vector.load %arg2[%c0_1, %c0_2] : memref<144x32xf32, #tpu.memory_space<vmem>>, vector<128x32xf32>
    %cst = arith.constant dense<0.000000e+00> : vector<16x32xf32>
    %7 = tpu.matmul %5, %6, %cst {dimension_numbers = #tpu.dot_dimension_numbers<[1], [0], [0], [1], [0, 0, 1, 1], [], []>} : vector<16x128xf32>, vector<128x32xf32>, vector<16x32xf32> -> vector<16x32xf32>
    %c128 = arith.constant 128 : index
    %c0_3 = arith.constant 0 : index
    %8 = vector.load %arg2[%c128, %c0_3] : memref<144x32xf32, #tpu.memory_space<vmem>>, vector<8x32xf32>
    %c136 = arith.constant 136 : index
    %c0_4 = arith.constant 0 : index
    %9 = vector.load %arg2[%c136, %c0_4] : memref<144x32xf32, #tpu.memory_space<vmem>>, vector<1x32xf32>
    %10 = vector.shape_cast %7 : vector<16x32xf32> to vector<2x8x32xf32>
    %11 = vector.shape_cast %8 : vector<8x32xf32> to vector<1x8x32xf32>
    %12 = vector.broadcast %11 : vector<1x8x32xf32> to vector<2x8x32xf32>
    %13 = arith.addf %10, %12 : vector<2x8x32xf32>
    %14 = vector.shape_cast %13 : vector<2x8x32xf32> to vector<16x32xf32>
    %15 = vector.broadcast %9 : vector<1x32xf32> to vector<16x32xf32>
    %16 = arith.addf %14, %15 : vector<16x32xf32>
    %c137 = arith.constant 137 : index
    %c0_5 = arith.constant 0 : index
    %17 = vector.load %arg2[%c137, %c0_5] : memref<144x32xf32, #tpu.memory_space<vmem>>, vector<1x32xf32>
    %c138 = arith.constant 138 : index
    %c0_6 = arith.constant 0 : index
    %18 = vector.load %arg2[%c138, %c0_6] : memref<144x32xf32, #tpu.memory_space<vmem>>, vector<1x32xf32>
    %cst_7 = arith.constant dense<0.000000e+00> : vector<16xf32>
    %19 = vector.multi_reduction <add>, %16, %cst_7 [1] : vector<16x32xf32> to vector<16xf32>
    %20 = vector.shape_cast %19 : vector<16xf32> to vector<16x1xf32>
    %cst_8 = arith.constant 3.125000e-02 : f32
    %21 = vector.broadcast %cst_8 : f32 to vector<16x1xf32>
    %22 = arith.mulf %20, %21 : vector<16x1xf32>
    %23 = vector.broadcast %22 : vector<16x1xf32> to vector<16x32xf32>
    %24 = arith.subf %16, %23 : vector<16x32xf32>
    %25 = arith.mulf %24, %24 : vector<16x32xf32>
    %cst_9 = arith.constant dense<0.000000e+00> : vector<16xf32>
    %26 = vector.multi_reduction <add>, %25, %cst_9 [1] : vector<16x32xf32> to vector<16xf32>
    %27 = vector.shape_cast %26 : vector<16xf32> to vector<16x1xf32>
    %cst_10 = arith.constant 3.125000e-02 : f32
    %28 = vector.broadcast %cst_10 : f32 to vector<16x1xf32>
    %29 = arith.mulf %27, %28 : vector<16x1xf32>
    %cst_11 = arith.constant 9.99999974E-6 : f32
    %30 = vector.broadcast %cst_11 : f32 to vector<16x1xf32>
    %31 = arith.addf %29, %30 : vector<16x1xf32>
    %32 = math.rsqrt %31 : vector<16x1xf32>
    %33 = vector.broadcast %32 : vector<16x1xf32> to vector<16x32xf32>
    %34 = arith.mulf %24, %33 : vector<16x32xf32>
    %35 = vector.broadcast %17 : vector<1x32xf32> to vector<16x32xf32>
    %36 = arith.mulf %34, %35 : vector<16x32xf32>
    %37 = vector.broadcast %18 : vector<1x32xf32> to vector<16x32xf32>
    %38 = arith.addf %36, %37 : vector<16x32xf32>
    %c0_12 = arith.constant 0 : index
    %c0_13 = arith.constant 0 : index
    %39 = vector.load %arg1[%c0_12, %c0_13] : memref<2x8xf32, #tpu.memory_space<vmem>>, vector<2x8xf32>
    %cst_14 = arith.constant 1.000000e+00 : f32
    %40 = vector.broadcast %cst_14 : f32 to vector<2x8xf32>
    %41 = arith.subf %40, %39 : vector<2x8xf32>
    %cst_15 = arith.constant -1.000000e+09 : f32
    %42 = vector.broadcast %cst_15 : f32 to vector<2x8xf32>
    %43 = arith.mulf %41, %42 : vector<2x8xf32>
    %44 = vector.shape_cast %43 : vector<2x8xf32> to vector<2x1x8xf32>
    %c0_16 = arith.constant 0 : index
    %c0_17 = arith.constant 0 : index
    %c0_18 = arith.constant 0 : index
    %c0_19 = arith.constant 0 : index
    %c0_20 = arith.constant 0 : index
    %45 = vector.load %arg3[%c0_16, %c0_17, %c0_18, %c0_19, %c0_20] : memref<2x2x4x32x16xf32, #tpu.memory_space<vmem>>, vector<1x1x1x32x16xf32>
    %46 = vector.shape_cast %45 : vector<1x1x1x32x16xf32> to vector<32x16xf32>
    %cst_21 = arith.constant dense<0.000000e+00> : vector<16x16xf32>
    %47 = tpu.matmul %38, %46, %cst_21 {dimension_numbers = #tpu.dot_dimension_numbers<[1], [0], [0], [1], [0, 0, 1, 1], [], []>} : vector<16x32xf32>, vector<32x16xf32>, vector<16x16xf32> -> vector<16x16xf32>
    %c0_22 = arith.constant 0 : index
    %c0_23 = arith.constant 0 : index
    %c0_24 = arith.constant 0 : index
    %c0_25 = arith.constant 0 : index
    %c0_26 = arith.constant 0 : index
    %48 = vector.load %arg4[%c0_22, %c0_23, %c0_24, %c0_25, %c0_26] : memref<2x2x3x1x16xf32, #tpu.memory_space<vmem>>, vector<1x1x1x1x16xf32>
    %49 = vector.shape_cast %48 : vector<1x1x1x1x16xf32> to vector<1x16xf32>
    %50 = vector.broadcast %49 : vector<1x16xf32> to vector<16x16xf32>
    %51 = arith.addf %47, %50 : vector<16x16xf32>
    %52 = vector.shape_cast %51 : vector<16x16xf32> to vector<2x8x16xf32>
    %c0_27 = arith.constant 0 : index
    %c0_28 = arith.constant 0 : index
    %c1 = arith.constant 1 : index
    %c0_29 = arith.constant 0 : index
    %c0_30 = arith.constant 0 : index
    %53 = vector.load %arg3[%c0_27, %c0_28, %c1, %c0_29, %c0_30] : memref<2x2x4x32x16xf32, #tpu.memory_space<vmem>>, vector<1x1x1x32x16xf32>
    %54 = vector.shape_cast %53 : vector<1x1x1x32x16xf32> to vector<32x16xf32>
    %cst_31 = arith.constant dense<0.000000e+00> : vector<16x16xf32>
    %55 = tpu.matmul %38, %54, %cst_31 {dimension_numbers = #tpu.dot_dimension_numbers<[1], [0], [0], [1], [0, 0, 1, 1], [], []>} : vector<16x32xf32>, vector<32x16xf32>, vector<16x16xf32> -> vector<16x16xf32>
    %c0_32 = arith.constant 0 : index
    %c0_33 = arith.constant 0 : index
    %c1_34 = arith.constant 1 : index
    %c0_35 = arith.constant 0 : index
    %c0_36 = arith.constant 0 : index
    %56 = vector.load %arg4[%c0_32, %c0_33, %c1_34, %c0_35, %c0_36] : memref<2x2x3x1x16xf32, #tpu.memory_space<vmem>>, vector<1x1x1x1x16xf32>
    %57 = vector.shape_cast %56 : vector<1x1x1x1x16xf32> to vector<1x16xf32>
    %58 = vector.broadcast %57 : vector<1x16xf32> to vector<16x16xf32>
    %59 = arith.addf %55, %58 : vector<16x16xf32>
    %60 = vector.shape_cast %59 : vector<16x16xf32> to vector<2x8x16xf32>
    %c0_37 = arith.constant 0 : index
    %c0_38 = arith.constant 0 : index
    %c2 = arith.constant 2 : index
    %c0_39 = arith.constant 0 : index
    %c0_40 = arith.constant 0 : index
    %61 = vector.load %arg3[%c0_37, %c0_38, %c2, %c0_39, %c0_40] : memref<2x2x4x32x16xf32, #tpu.memory_space<vmem>>, vector<1x1x1x32x16xf32>
    %62 = vector.shape_cast %61 : vector<1x1x1x32x16xf32> to vector<32x16xf32>
    %cst_41 = arith.constant dense<0.000000e+00> : vector<16x16xf32>
    %63 = tpu.matmul %38, %62, %cst_41 {dimension_numbers = #tpu.dot_dimension_numbers<[1], [0], [0], [1], [0, 0, 1, 1], [], []>} : vector<16x32xf32>, vector<32x16xf32>, vector<16x16xf32> -> vector<16x16xf32>
    %c0_42 = arith.constant 0 : index
    %c0_43 = arith.constant 0 : index
    %c2_44 = arith.constant 2 : index
    %c0_45 = arith.constant 0 : index
    %c0_46 = arith.constant 0 : index
    %64 = vector.load %arg4[%c0_42, %c0_43, %c2_44, %c0_45, %c0_46] : memref<2x2x3x1x16xf32, #tpu.memory_space<vmem>>, vector<1x1x1x1x16xf32>
    %65 = vector.shape_cast %64 : vector<1x1x1x1x16xf32> to vector<1x16xf32>
    %66 = vector.broadcast %65 : vector<1x16xf32> to vector<16x16xf32>
    %67 = arith.addf %63, %66 : vector<16x16xf32>
    %68 = vector.shape_cast %67 : vector<16x16xf32> to vector<2x8x16xf32>
    "tpu.trace_start"() <{level = 10 : i32, message = "bqd,bkd->bqk"}> : () -> ()
    %cst_47 = arith.constant dense<0.000000e+00> : vector<2x8x8xf32>
    %69 = tpu.matmul %52, %60, %cst_47 {dimension_numbers = #tpu.dot_dimension_numbers<[2], [2], [1], [1], [0, 0, 0, 1, 1, 1], [0], [0]>} : vector<2x8x16xf32>, vector<2x8x16xf32>, vector<2x8x8xf32> -> vector<2x8x8xf32>
    "tpu.trace_stop"() : () -> ()
    %70 = vector.broadcast %44 : vector<2x1x8xf32> to vector<2x8x8xf32>
    %71 = arith.addf %69, %70 : vector<2x8x8xf32>
    %cst_48 = arith.constant dense<0xFF800000> : vector<2x8xf32>
    %72 = vector.multi_reduction <maximumf>, %71, %cst_48 [2] : vector<2x8x8xf32> to vector<2x8xf32>
    %73 = vector.shape_cast %72 : vector<2x8xf32> to vector<2x8x1xf32>
    %74 = vector.broadcast %73 : vector<2x8x1xf32> to vector<2x8x8xf32>
    %75 = arith.subf %71, %74 : vector<2x8x8xf32>
    %76 = math.exp %75 : vector<2x8x8xf32>
    %cst_49 = arith.constant dense<0.000000e+00> : vector<2x8xf32>
    %77 = vector.multi_reduction <add>, %76, %cst_49 [2] : vector<2x8x8xf32> to vector<2x8xf32>
    %78 = vector.shape_cast %77 : vector<2x8xf32> to vector<2x8x1xf32>
    %79 = tpu.reciprocal %78 : vector<2x8x1xf32> -> vector<2x8x1xf32>
    %80 = vector.broadcast %79 : vector<2x8x1xf32> to vector<2x8x8xf32>
    %81 = arith.mulf %76, %80 : vector<2x8x8xf32>
    "tpu.trace_start"() <{level = 10 : i32, message = "bqk,bkd->bqd"}> : () -> ()
    %cst_50 = arith.constant dense<0.000000e+00> : vector<2x8x16xf32>
    %82 = tpu.matmul %81, %68, %cst_50 {dimension_numbers = #tpu.dot_dimension_numbers<[2], [1], [1], [2], [0, 0, 0, 1, 1, 2], [0], [0]>} : vector<2x8x8xf32>, vector<2x8x16xf32>, vector<2x8x16xf32> -> vector<2x8x16xf32>
    "tpu.trace_stop"() : () -> ()
    %83 = vector.shape_cast %82 : vector<2x8x16xf32> to vector<16x16xf32>
    %c0_51 = arith.constant 0 : index
    %c0_52 = arith.constant 0 : index
    %c3 = arith.constant 3 : index
    %c0_53 = arith.constant 0 : index
    %c0_54 = arith.constant 0 : index
    %84 = vector.load %arg3[%c0_51, %c0_52, %c3, %c0_53, %c0_54] : memref<2x2x4x32x16xf32, #tpu.memory_space<vmem>>, vector<1x1x1x32x16xf32>
    %85 = vector.shape_cast %84 : vector<1x1x1x32x16xf32> to vector<32x16xf32>
    %cst_55 = arith.constant dense<0.000000e+00> : vector<16x32xf32>
    %86 = tpu.matmul %83, %85, %cst_55 {dimension_numbers = #tpu.dot_dimension_numbers<[1], [1], [0], [0], [0, 0, 1, 0], [], []>} : vector<16x16xf32>, vector<32x16xf32>, vector<16x32xf32> -> vector<16x32xf32>
    %c0_56 = arith.constant 0 : index
    %c1_57 = arith.constant 1 : index
    %c0_58 = arith.constant 0 : index
    %c0_59 = arith.constant 0 : index
    %c0_60 = arith.constant 0 : index
    %87 = vector.load %arg3[%c0_56, %c1_57, %c0_58, %c0_59, %c0_60] : memref<2x2x4x32x16xf32, #tpu.memory_space<vmem>>, vector<1x1x1x32x16xf32>
    %88 = vector.shape_cast %87 : vector<1x1x1x32x16xf32> to vector<32x16xf32>
    %cst_61 = arith.constant dense<0.000000e+00> : vector<16x16xf32>
    %89 = tpu.matmul %38, %88, %cst_61 {dimension_numbers = #tpu.dot_dimension_numbers<[1], [0], [0], [1], [0, 0, 1, 1], [], []>} : vector<16x32xf32>, vector<32x16xf32>, vector<16x16xf32> -> vector<16x16xf32>
    %c0_62 = arith.constant 0 : index
    %c1_63 = arith.constant 1 : index
    %c0_64 = arith.constant 0 : index
    %c0_65 = arith.constant 0 : index
    %c0_66 = arith.constant 0 : index
    %90 = vector.load %arg4[%c0_62, %c1_63, %c0_64, %c0_65, %c0_66] : memref<2x2x3x1x16xf32, #tpu.memory_space<vmem>>, vector<1x1x1x1x16xf32>
    %91 = vector.shape_cast %90 : vector<1x1x1x1x16xf32> to vector<1x16xf32>
    %92 = vector.broadcast %91 : vector<1x16xf32> to vector<16x16xf32>
    %93 = arith.addf %89, %92 : vector<16x16xf32>
    %94 = vector.shape_cast %93 : vector<16x16xf32> to vector<2x8x16xf32>
    %c0_67 = arith.constant 0 : index
    %c1_68 = arith.constant 1 : index
    %c1_69 = arith.constant 1 : index
    %c0_70 = arith.constant 0 : index
    %c0_71 = arith.constant 0 : index
    %95 = vector.load %arg3[%c0_67, %c1_68, %c1_69, %c0_70, %c0_71] : memref<2x2x4x32x16xf32, #tpu.memory_space<vmem>>, vector<1x1x1x32x16xf32>
    %96 = vector.shape_cast %95 : vector<1x1x1x32x16xf32> to vector<32x16xf32>
    %cst_72 = arith.constant dense<0.000000e+00> : vector<16x16xf32>
    %97 = tpu.matmul %38, %96, %cst_72 {dimension_numbers = #tpu.dot_dimension_numbers<[1], [0], [0], [1], [0, 0, 1, 1], [], []>} : vector<16x32xf32>, vector<32x16xf32>, vector<16x16xf32> -> vector<16x16xf32>
    %c0_73 = arith.constant 0 : index
    %c1_74 = arith.constant 1 : index
    %c1_75 = arith.constant 1 : index
    %c0_76 = arith.constant 0 : index
    %c0_77 = arith.constant 0 : index
    %98 = vector.load %arg4[%c0_73, %c1_74, %c1_75, %c0_76, %c0_77] : memref<2x2x3x1x16xf32, #tpu.memory_space<vmem>>, vector<1x1x1x1x16xf32>
    %99 = vector.shape_cast %98 : vector<1x1x1x1x16xf32> to vector<1x16xf32>
    %100 = vector.broadcast %99 : vector<1x16xf32> to vector<16x16xf32>
    %101 = arith.addf %97, %100 : vector<16x16xf32>
    %102 = vector.shape_cast %101 : vector<16x16xf32> to vector<2x8x16xf32>
    %c0_78 = arith.constant 0 : index
    %c1_79 = arith.constant 1 : index
    %c2_80 = arith.constant 2 : index
    %c0_81 = arith.constant 0 : index
    %c0_82 = arith.constant 0 : index
    %103 = vector.load %arg3[%c0_78, %c1_79, %c2_80, %c0_81, %c0_82] : memref<2x2x4x32x16xf32, #tpu.memory_space<vmem>>, vector<1x1x1x32x16xf32>
    %104 = vector.shape_cast %103 : vector<1x1x1x32x16xf32> to vector<32x16xf32>
    %cst_83 = arith.constant dense<0.000000e+00> : vector<16x16xf32>
    %105 = tpu.matmul %38, %104, %cst_83 {dimension_numbers = #tpu.dot_dimension_numbers<[1], [0], [0], [1], [0, 0, 1, 1], [], []>} : vector<16x32xf32>, vector<32x16xf32>, vector<16x16xf32> -> vector<16x16xf32>
    %c0_84 = arith.constant 0 : index
    %c1_85 = arith.constant 1 : index
    %c2_86 = arith.constant 2 : index
    %c0_87 = arith.constant 0 : index
    %c0_88 = arith.constant 0 : index
    %106 = vector.load %arg4[%c0_84, %c1_85, %c2_86, %c0_87, %c0_88] : memref<2x2x3x1x16xf32, #tpu.memory_space<vmem>>, vector<1x1x1x1x16xf32>
    %107 = vector.shape_cast %106 : vector<1x1x1x1x16xf32> to vector<1x16xf32>
    %108 = vector.broadcast %107 : vector<1x16xf32> to vector<16x16xf32>
    %109 = arith.addf %105, %108 : vector<16x16xf32>
    %110 = vector.shape_cast %109 : vector<16x16xf32> to vector<2x8x16xf32>
    "tpu.trace_start"() <{level = 10 : i32, message = "bqd,bkd->bqk"}> : () -> ()
    %cst_89 = arith.constant dense<0.000000e+00> : vector<2x8x8xf32>
    %111 = tpu.matmul %94, %102, %cst_89 {dimension_numbers = #tpu.dot_dimension_numbers<[2], [2], [1], [1], [0, 0, 0, 1, 1, 1], [0], [0]>} : vector<2x8x16xf32>, vector<2x8x16xf32>, vector<2x8x8xf32> -> vector<2x8x8xf32>
    "tpu.trace_stop"() : () -> ()
    %112 = vector.broadcast %44 : vector<2x1x8xf32> to vector<2x8x8xf32>
    %113 = arith.addf %111, %112 : vector<2x8x8xf32>
    %cst_90 = arith.constant dense<0xFF800000> : vector<2x8xf32>
    %114 = vector.multi_reduction <maximumf>, %113, %cst_90 [2] : vector<2x8x8xf32> to vector<2x8xf32>
    %115 = vector.shape_cast %114 : vector<2x8xf32> to vector<2x8x1xf32>
    %116 = vector.broadcast %115 : vector<2x8x1xf32> to vector<2x8x8xf32>
    %117 = arith.subf %113, %116 : vector<2x8x8xf32>
    %118 = math.exp %117 : vector<2x8x8xf32>
    %cst_91 = arith.constant dense<0.000000e+00> : vector<2x8xf32>
    %119 = vector.multi_reduction <add>, %118, %cst_91 [2] : vector<2x8x8xf32> to vector<2x8xf32>
    %120 = vector.shape_cast %119 : vector<2x8xf32> to vector<2x8x1xf32>
    %121 = tpu.reciprocal %120 : vector<2x8x1xf32> -> vector<2x8x1xf32>
    %122 = vector.broadcast %121 : vector<2x8x1xf32> to vector<2x8x8xf32>
    %123 = arith.mulf %118, %122 : vector<2x8x8xf32>
    "tpu.trace_start"() <{level = 10 : i32, message = "bqk,bkd->bqd"}> : () -> ()
    %cst_92 = arith.constant dense<0.000000e+00> : vector<2x8x16xf32>
    %124 = tpu.matmul %123, %110, %cst_92 {dimension_numbers = #tpu.dot_dimension_numbers<[2], [1], [1], [2], [0, 0, 0, 1, 1, 2], [0], [0]>} : vector<2x8x8xf32>, vector<2x8x16xf32>, vector<2x8x16xf32> -> vector<2x8x16xf32>
    "tpu.trace_stop"() : () -> ()
    %125 = vector.shape_cast %124 : vector<2x8x16xf32> to vector<16x16xf32>
    %c0_93 = arith.constant 0 : index
    %c1_94 = arith.constant 1 : index
    %c3_95 = arith.constant 3 : index
    %c0_96 = arith.constant 0 : index
    %c0_97 = arith.constant 0 : index
    %126 = vector.load %arg3[%c0_93, %c1_94, %c3_95, %c0_96, %c0_97] : memref<2x2x4x32x16xf32, #tpu.memory_space<vmem>>, vector<1x1x1x32x16xf32>
    %127 = vector.shape_cast %126 : vector<1x1x1x32x16xf32> to vector<32x16xf32>
    %cst_98 = arith.constant dense<0.000000e+00> : vector<16x32xf32>
    %128 = tpu.matmul %125, %127, %cst_98 {dimension_numbers = #tpu.dot_dimension_numbers<[1], [1], [0], [0], [0, 0, 1, 0], [], []>} : vector<16x16xf32>, vector<32x16xf32>, vector<16x32xf32> -> vector<16x32xf32>
    %129 = arith.addf %86, %128 : vector<16x32xf32>
    %c0_99 = arith.constant 0 : index
    %c96 = arith.constant 96 : index
    %c0_100 = arith.constant 0 : index
    %130 = vector.load %arg5[%c0_99, %c96, %c0_100] : memref<2x104x64xf32, #tpu.memory_space<vmem>>, vector<1x1x32xf32>
    %131 = vector.shape_cast %130 : vector<1x1x32xf32> to vector<1x32xf32>
    %132 = vector.broadcast %131 : vector<1x32xf32> to vector<16x32xf32>
    %133 = arith.addf %129, %132 : vector<16x32xf32>
    %134 = arith.addf %133, %38 : vector<16x32xf32>
    %c0_101 = arith.constant 0 : index
    %c97 = arith.constant 97 : index
    %c0_102 = arith.constant 0 : index
    %135 = vector.load %arg5[%c0_101, %c97, %c0_102] : memref<2x104x64xf32, #tpu.memory_space<vmem>>, vector<1x1x32xf32>
    %136 = vector.shape_cast %135 : vector<1x1x32xf32> to vector<1x32xf32>
    %c0_103 = arith.constant 0 : index
    %c98 = arith.constant 98 : index
    %c0_104 = arith.constant 0 : index
    %137 = vector.load %arg5[%c0_103, %c98, %c0_104] : memref<2x104x64xf32, #tpu.memory_space<vmem>>, vector<1x1x32xf32>
    %138 = vector.shape_cast %137 : vector<1x1x32xf32> to vector<1x32xf32>
    %cst_105 = arith.constant dense<0.000000e+00> : vector<16xf32>
    %139 = vector.multi_reduction <add>, %134, %cst_105 [1] : vector<16x32xf32> to vector<16xf32>
    %140 = vector.shape_cast %139 : vector<16xf32> to vector<16x1xf32>
    %cst_106 = arith.constant 3.125000e-02 : f32
    %141 = vector.broadcast %cst_106 : f32 to vector<16x1xf32>
    %142 = arith.mulf %140, %141 : vector<16x1xf32>
    %143 = vector.broadcast %142 : vector<16x1xf32> to vector<16x32xf32>
    %144 = arith.subf %134, %143 : vector<16x32xf32>
    %145 = arith.mulf %144, %144 : vector<16x32xf32>
    %cst_107 = arith.constant dense<0.000000e+00> : vector<16xf32>
    %146 = vector.multi_reduction <add>, %145, %cst_107 [1] : vector<16x32xf32> to vector<16xf32>
    %147 = vector.shape_cast %146 : vector<16xf32> to vector<16x1xf32>
    %cst_108 = arith.constant 3.125000e-02 : f32
    %148 = vector.broadcast %cst_108 : f32 to vector<16x1xf32>
    %149 = arith.mulf %147, %148 : vector<16x1xf32>
    %cst_109 = arith.constant 9.99999974E-6 : f32
    %150 = vector.broadcast %cst_109 : f32 to vector<16x1xf32>
    %151 = arith.addf %149, %150 : vector<16x1xf32>
    %152 = math.rsqrt %151 : vector<16x1xf32>
    %153 = vector.broadcast %152 : vector<16x1xf32> to vector<16x32xf32>
    %154 = arith.mulf %144, %153 : vector<16x32xf32>
    %155 = vector.broadcast %136 : vector<1x32xf32> to vector<16x32xf32>
    %156 = arith.mulf %154, %155 : vector<16x32xf32>
    %157 = vector.broadcast %138 : vector<1x32xf32> to vector<16x32xf32>
    %158 = arith.addf %156, %157 : vector<16x32xf32>
    %c0_110 = arith.constant 0 : index
    %c0_111 = arith.constant 0 : index
    %c0_112 = arith.constant 0 : index
    %159 = vector.load %arg5[%c0_110, %c0_111, %c0_112] : memref<2x104x64xf32, #tpu.memory_space<vmem>>, vector<1x32x64xf32>
    %160 = vector.shape_cast %159 : vector<1x32x64xf32> to vector<32x64xf32>
    %c0_113 = arith.constant 0 : index
    %c32 = arith.constant 32 : index
    %c0_114 = arith.constant 0 : index
    %161 = vector.load %arg5[%c0_113, %c32, %c0_114] : memref<2x104x64xf32, #tpu.memory_space<vmem>>, vector<1x64x32xf32>
    %162 = vector.shape_cast %161 : vector<1x64x32xf32> to vector<64x32xf32>
    %cst_115 = arith.constant dense<0.000000e+00> : vector<16x64xf32>
    %163 = tpu.matmul %158, %160, %cst_115 {dimension_numbers = #tpu.dot_dimension_numbers<[1], [0], [0], [1], [0, 0, 1, 1], [], []>} : vector<16x32xf32>, vector<32x64xf32>, vector<16x64xf32> -> vector<16x64xf32>
    %c0_116 = arith.constant 0 : index
    %c99 = arith.constant 99 : index
    %c0_117 = arith.constant 0 : index
    %164 = vector.load %arg5[%c0_116, %c99, %c0_117] : memref<2x104x64xf32, #tpu.memory_space<vmem>>, vector<1x1x64xf32>
    %165 = vector.shape_cast %164 : vector<1x1x64xf32> to vector<1x64xf32>
    %166 = vector.broadcast %165 : vector<1x64xf32> to vector<16x64xf32>
    %167 = arith.addf %163, %166 : vector<16x64xf32>
    %cst_118 = arith.constant 5.000000e-01 : f32
    %168 = vector.broadcast %cst_118 : f32 to vector<16x64xf32>
    %169 = arith.mulf %168, %167 : vector<16x64xf32>
    %cst_119 = arith.constant 4.471500e-02 : f32
    %170 = vector.broadcast %cst_119 : f32 to vector<16x64xf32>
    %171 = arith.mulf %170, %167 : vector<16x64xf32>
    %172 = arith.mulf %171, %167 : vector<16x64xf32>
    %173 = arith.mulf %172, %167 : vector<16x64xf32>
    %174 = arith.addf %167, %173 : vector<16x64xf32>
    %cst_120 = arith.constant 0.797884583 : f32
    %175 = vector.broadcast %cst_120 : f32 to vector<16x64xf32>
    %176 = arith.mulf %175, %174 : vector<16x64xf32>
    %177 = math.tanh %176 : vector<16x64xf32>
    %cst_121 = arith.constant 1.000000e+00 : f32
    %178 = vector.broadcast %cst_121 : f32 to vector<16x64xf32>
    %179 = arith.addf %178, %177 : vector<16x64xf32>
    %180 = arith.mulf %169, %179 : vector<16x64xf32>
    %cst_122 = arith.constant dense<0.000000e+00> : vector<16x32xf32>
    %181 = tpu.matmul %180, %162, %cst_122 {dimension_numbers = #tpu.dot_dimension_numbers<[1], [0], [0], [1], [0, 0, 1, 1], [], []>} : vector<16x64xf32>, vector<64x32xf32>, vector<16x32xf32> -> vector<16x32xf32>
    %c0_123 = arith.constant 0 : index
    %c100 = arith.constant 100 : index
    %c0_124 = arith.constant 0 : index
    %182 = vector.load %arg5[%c0_123, %c100, %c0_124] : memref<2x104x64xf32, #tpu.memory_space<vmem>>, vector<1x1x32xf32>
    %183 = vector.shape_cast %182 : vector<1x1x32xf32> to vector<1x32xf32>
    %184 = vector.broadcast %183 : vector<1x32xf32> to vector<16x32xf32>
    %185 = arith.addf %181, %184 : vector<16x32xf32>
    %186 = arith.addf %185, %158 : vector<16x32xf32>
    %c0_125 = arith.constant 0 : index
    %c101 = arith.constant 101 : index
    %c0_126 = arith.constant 0 : index
    %187 = vector.load %arg5[%c0_125, %c101, %c0_126] : memref<2x104x64xf32, #tpu.memory_space<vmem>>, vector<1x1x32xf32>
    %188 = vector.shape_cast %187 : vector<1x1x32xf32> to vector<1x32xf32>
    %c0_127 = arith.constant 0 : index
    %c102 = arith.constant 102 : index
    %c0_128 = arith.constant 0 : index
    %189 = vector.load %arg5[%c0_127, %c102, %c0_128] : memref<2x104x64xf32, #tpu.memory_space<vmem>>, vector<1x1x32xf32>
    %190 = vector.shape_cast %189 : vector<1x1x32xf32> to vector<1x32xf32>
    %cst_129 = arith.constant dense<0.000000e+00> : vector<16xf32>
    %191 = vector.multi_reduction <add>, %186, %cst_129 [1] : vector<16x32xf32> to vector<16xf32>
    %192 = vector.shape_cast %191 : vector<16xf32> to vector<16x1xf32>
    %cst_130 = arith.constant 3.125000e-02 : f32
    %193 = vector.broadcast %cst_130 : f32 to vector<16x1xf32>
    %194 = arith.mulf %192, %193 : vector<16x1xf32>
    %195 = vector.broadcast %194 : vector<16x1xf32> to vector<16x32xf32>
    %196 = arith.subf %186, %195 : vector<16x32xf32>
    %197 = arith.mulf %196, %196 : vector<16x32xf32>
    %cst_131 = arith.constant dense<0.000000e+00> : vector<16xf32>
    %198 = vector.multi_reduction <add>, %197, %cst_131 [1] : vector<16x32xf32> to vector<16xf32>
    %199 = vector.shape_cast %198 : vector<16xf32> to vector<16x1xf32>
    %cst_132 = arith.constant 3.125000e-02 : f32
    %200 = vector.broadcast %cst_132 : f32 to vector<16x1xf32>
    %201 = arith.mulf %199, %200 : vector<16x1xf32>
    %cst_133 = arith.constant 9.99999974E-6 : f32
    %202 = vector.broadcast %cst_133 : f32 to vector<16x1xf32>
    %203 = arith.addf %201, %202 : vector<16x1xf32>
    %204 = math.rsqrt %203 : vector<16x1xf32>
    %205 = vector.broadcast %204 : vector<16x1xf32> to vector<16x32xf32>
    %206 = arith.mulf %196, %205 : vector<16x32xf32>
    %207 = vector.broadcast %188 : vector<1x32xf32> to vector<16x32xf32>
    %208 = arith.mulf %206, %207 : vector<16x32xf32>
    %209 = vector.broadcast %190 : vector<1x32xf32> to vector<16x32xf32>
    %210 = arith.addf %208, %209 : vector<16x32xf32>
    %c1_134 = arith.constant 1 : index
    %c0_135 = arith.constant 0 : index
    %c0_136 = arith.constant 0 : index
    %c0_137 = arith.constant 0 : index
    %c0_138 = arith.constant 0 : index
    %211 = vector.load %arg3[%c1_134, %c0_135, %c0_136, %c0_137, %c0_138] : memref<2x2x4x32x16xf32, #tpu.memory_space<vmem>>, vector<1x1x1x32x16xf32>
    %212 = vector.shape_cast %211 : vector<1x1x1x32x16xf32> to vector<32x16xf32>
    %cst_139 = arith.constant dense<0.000000e+00> : vector<16x16xf32>
    %213 = tpu.matmul %210, %212, %cst_139 {dimension_numbers = #tpu.dot_dimension_numbers<[1], [0], [0], [1], [0, 0, 1, 1], [], []>} : vector<16x32xf32>, vector<32x16xf32>, vector<16x16xf32> -> vector<16x16xf32>
    %c1_140 = arith.constant 1 : index
    %c0_141 = arith.constant 0 : index
    %c0_142 = arith.constant 0 : index
    %c0_143 = arith.constant 0 : index
    %c0_144 = arith.constant 0 : index
    %214 = vector.load %arg4[%c1_140, %c0_141, %c0_142, %c0_143, %c0_144] : memref<2x2x3x1x16xf32, #tpu.memory_space<vmem>>, vector<1x1x1x1x16xf32>
    %215 = vector.shape_cast %214 : vector<1x1x1x1x16xf32> to vector<1x16xf32>
    %216 = vector.broadcast %215 : vector<1x16xf32> to vector<16x16xf32>
    %217 = arith.addf %213, %216 : vector<16x16xf32>
    %218 = vector.shape_cast %217 : vector<16x16xf32> to vector<2x8x16xf32>
    %c1_145 = arith.constant 1 : index
    %c0_146 = arith.constant 0 : index
    %c1_147 = arith.constant 1 : index
    %c0_148 = arith.constant 0 : index
    %c0_149 = arith.constant 0 : index
    %219 = vector.load %arg3[%c1_145, %c0_146, %c1_147, %c0_148, %c0_149] : memref<2x2x4x32x16xf32, #tpu.memory_space<vmem>>, vector<1x1x1x32x16xf32>
    %220 = vector.shape_cast %219 : vector<1x1x1x32x16xf32> to vector<32x16xf32>
    %cst_150 = arith.constant dense<0.000000e+00> : vector<16x16xf32>
    %221 = tpu.matmul %210, %220, %cst_150 {dimension_numbers = #tpu.dot_dimension_numbers<[1], [0], [0], [1], [0, 0, 1, 1], [], []>} : vector<16x32xf32>, vector<32x16xf32>, vector<16x16xf32> -> vector<16x16xf32>
    %c1_151 = arith.constant 1 : index
    %c0_152 = arith.constant 0 : index
    %c1_153 = arith.constant 1 : index
    %c0_154 = arith.constant 0 : index
    %c0_155 = arith.constant 0 : index
    %222 = vector.load %arg4[%c1_151, %c0_152, %c1_153, %c0_154, %c0_155] : memref<2x2x3x1x16xf32, #tpu.memory_space<vmem>>, vector<1x1x1x1x16xf32>
    %223 = vector.shape_cast %222 : vector<1x1x1x1x16xf32> to vector<1x16xf32>
    %224 = vector.broadcast %223 : vector<1x16xf32> to vector<16x16xf32>
    %225 = arith.addf %221, %224 : vector<16x16xf32>
    %226 = vector.shape_cast %225 : vector<16x16xf32> to vector<2x8x16xf32>
    %c1_156 = arith.constant 1 : index
    %c0_157 = arith.constant 0 : index
    %c2_158 = arith.constant 2 : index
    %c0_159 = arith.constant 0 : index
    %c0_160 = arith.constant 0 : index
    %227 = vector.load %arg3[%c1_156, %c0_157, %c2_158, %c0_159, %c0_160] : memref<2x2x4x32x16xf32, #tpu.memory_space<vmem>>, vector<1x1x1x32x16xf32>
    %228 = vector.shape_cast %227 : vector<1x1x1x32x16xf32> to vector<32x16xf32>
    %cst_161 = arith.constant dense<0.000000e+00> : vector<16x16xf32>
    %229 = tpu.matmul %210, %228, %cst_161 {dimension_numbers = #tpu.dot_dimension_numbers<[1], [0], [0], [1], [0, 0, 1, 1], [], []>} : vector<16x32xf32>, vector<32x16xf32>, vector<16x16xf32> -> vector<16x16xf32>
    %c1_162 = arith.constant 1 : index
    %c0_163 = arith.constant 0 : index
    %c2_164 = arith.constant 2 : index
    %c0_165 = arith.constant 0 : index
    %c0_166 = arith.constant 0 : index
    %230 = vector.load %arg4[%c1_162, %c0_163, %c2_164, %c0_165, %c0_166] : memref<2x2x3x1x16xf32, #tpu.memory_space<vmem>>, vector<1x1x1x1x16xf32>
    %231 = vector.shape_cast %230 : vector<1x1x1x1x16xf32> to vector<1x16xf32>
    %232 = vector.broadcast %231 : vector<1x16xf32> to vector<16x16xf32>
    %233 = arith.addf %229, %232 : vector<16x16xf32>
    %234 = vector.shape_cast %233 : vector<16x16xf32> to vector<2x8x16xf32>
    "tpu.trace_start"() <{level = 10 : i32, message = "bqd,bkd->bqk"}> : () -> ()
    %cst_167 = arith.constant dense<0.000000e+00> : vector<2x8x8xf32>
    %235 = tpu.matmul %218, %226, %cst_167 {dimension_numbers = #tpu.dot_dimension_numbers<[2], [2], [1], [1], [0, 0, 0, 1, 1, 1], [0], [0]>} : vector<2x8x16xf32>, vector<2x8x16xf32>, vector<2x8x8xf32> -> vector<2x8x8xf32>
    "tpu.trace_stop"() : () -> ()
    %236 = vector.broadcast %44 : vector<2x1x8xf32> to vector<2x8x8xf32>
    %237 = arith.addf %235, %236 : vector<2x8x8xf32>
    %cst_168 = arith.constant dense<0xFF800000> : vector<2x8xf32>
    %238 = vector.multi_reduction <maximumf>, %237, %cst_168 [2] : vector<2x8x8xf32> to vector<2x8xf32>
    %239 = vector.shape_cast %238 : vector<2x8xf32> to vector<2x8x1xf32>
    %240 = vector.broadcast %239 : vector<2x8x1xf32> to vector<2x8x8xf32>
    %241 = arith.subf %237, %240 : vector<2x8x8xf32>
    %242 = math.exp %241 : vector<2x8x8xf32>
    %cst_169 = arith.constant dense<0.000000e+00> : vector<2x8xf32>
    %243 = vector.multi_reduction <add>, %242, %cst_169 [2] : vector<2x8x8xf32> to vector<2x8xf32>
    %244 = vector.shape_cast %243 : vector<2x8xf32> to vector<2x8x1xf32>
    %245 = tpu.reciprocal %244 : vector<2x8x1xf32> -> vector<2x8x1xf32>
    %246 = vector.broadcast %245 : vector<2x8x1xf32> to vector<2x8x8xf32>
    %247 = arith.mulf %242, %246 : vector<2x8x8xf32>
    "tpu.trace_start"() <{level = 10 : i32, message = "bqk,bkd->bqd"}> : () -> ()
    %cst_170 = arith.constant dense<0.000000e+00> : vector<2x8x16xf32>
    %248 = tpu.matmul %247, %234, %cst_170 {dimension_numbers = #tpu.dot_dimension_numbers<[2], [1], [1], [2], [0, 0, 0, 1, 1, 2], [0], [0]>} : vector<2x8x8xf32>, vector<2x8x16xf32>, vector<2x8x16xf32> -> vector<2x8x16xf32>
    "tpu.trace_stop"() : () -> ()
    %249 = vector.shape_cast %248 : vector<2x8x16xf32> to vector<16x16xf32>
    %c1_171 = arith.constant 1 : index
    %c0_172 = arith.constant 0 : index
    %c3_173 = arith.constant 3 : index
    %c0_174 = arith.constant 0 : index
    %c0_175 = arith.constant 0 : index
    %250 = vector.load %arg3[%c1_171, %c0_172, %c3_173, %c0_174, %c0_175] : memref<2x2x4x32x16xf32, #tpu.memory_space<vmem>>, vector<1x1x1x32x16xf32>
    %251 = vector.shape_cast %250 : vector<1x1x1x32x16xf32> to vector<32x16xf32>
    %cst_176 = arith.constant dense<0.000000e+00> : vector<16x32xf32>
    %252 = tpu.matmul %249, %251, %cst_176 {dimension_numbers = #tpu.dot_dimension_numbers<[1], [1], [0], [0], [0, 0, 1, 0], [], []>} : vector<16x16xf32>, vector<32x16xf32>, vector<16x32xf32> -> vector<16x32xf32>
    %c1_177 = arith.constant 1 : index
    %c1_178 = arith.constant 1 : index
    %c0_179 = arith.constant 0 : index
    %c0_180 = arith.constant 0 : index
    %c0_181 = arith.constant 0 : index
    %253 = vector.load %arg3[%c1_177, %c1_178, %c0_179, %c0_180, %c0_181] : memref<2x2x4x32x16xf32, #tpu.memory_space<vmem>>, vector<1x1x1x32x16xf32>
    %254 = vector.shape_cast %253 : vector<1x1x1x32x16xf32> to vector<32x16xf32>
    %cst_182 = arith.constant dense<0.000000e+00> : vector<16x16xf32>
    %255 = tpu.matmul %210, %254, %cst_182 {dimension_numbers = #tpu.dot_dimension_numbers<[1], [0], [0], [1], [0, 0, 1, 1], [], []>} : vector<16x32xf32>, vector<32x16xf32>, vector<16x16xf32> -> vector<16x16xf32>
    %c1_183 = arith.constant 1 : index
    %c1_184 = arith.constant 1 : index
    %c0_185 = arith.constant 0 : index
    %c0_186 = arith.constant 0 : index
    %c0_187 = arith.constant 0 : index
    %256 = vector.load %arg4[%c1_183, %c1_184, %c0_185, %c0_186, %c0_187] : memref<2x2x3x1x16xf32, #tpu.memory_space<vmem>>, vector<1x1x1x1x16xf32>
    %257 = vector.shape_cast %256 : vector<1x1x1x1x16xf32> to vector<1x16xf32>
    %258 = vector.broadcast %257 : vector<1x16xf32> to vector<16x16xf32>
    %259 = arith.addf %255, %258 : vector<16x16xf32>
    %260 = vector.shape_cast %259 : vector<16x16xf32> to vector<2x8x16xf32>
    %c1_188 = arith.constant 1 : index
    %c1_189 = arith.constant 1 : index
    %c1_190 = arith.constant 1 : index
    %c0_191 = arith.constant 0 : index
    %c0_192 = arith.constant 0 : index
    %261 = vector.load %arg3[%c1_188, %c1_189, %c1_190, %c0_191, %c0_192] : memref<2x2x4x32x16xf32, #tpu.memory_space<vmem>>, vector<1x1x1x32x16xf32>
    %262 = vector.shape_cast %261 : vector<1x1x1x32x16xf32> to vector<32x16xf32>
    %cst_193 = arith.constant dense<0.000000e+00> : vector<16x16xf32>
    %263 = tpu.matmul %210, %262, %cst_193 {dimension_numbers = #tpu.dot_dimension_numbers<[1], [0], [0], [1], [0, 0, 1, 1], [], []>} : vector<16x32xf32>, vector<32x16xf32>, vector<16x16xf32> -> vector<16x16xf32>
    %c1_194 = arith.constant 1 : index
    %c1_195 = arith.constant 1 : index
    %c1_196 = arith.constant 1 : index
    %c0_197 = arith.constant 0 : index
    %c0_198 = arith.constant 0 : index
    %264 = vector.load %arg4[%c1_194, %c1_195, %c1_196, %c0_197, %c0_198] : memref<2x2x3x1x16xf32, #tpu.memory_space<vmem>>, vector<1x1x1x1x16xf32>
    %265 = vector.shape_cast %264 : vector<1x1x1x1x16xf32> to vector<1x16xf32>
    %266 = vector.broadcast %265 : vector<1x16xf32> to vector<16x16xf32>
    %267 = arith.addf %263, %266 : vector<16x16xf32>
    %268 = vector.shape_cast %267 : vector<16x16xf32> to vector<2x8x16xf32>
    %c1_199 = arith.constant 1 : index
    %c1_200 = arith.constant 1 : index
    %c2_201 = arith.constant 2 : index
    %c0_202 = arith.constant 0 : index
    %c0_203 = arith.constant 0 : index
    %269 = vector.load %arg3[%c1_199, %c1_200, %c2_201, %c0_202, %c0_203] : memref<2x2x4x32x16xf32, #tpu.memory_space<vmem>>, vector<1x1x1x32x16xf32>
    %270 = vector.shape_cast %269 : vector<1x1x1x32x16xf32> to vector<32x16xf32>
    %cst_204 = arith.constant dense<0.000000e+00> : vector<16x16xf32>
    %271 = tpu.matmul %210, %270, %cst_204 {dimension_numbers = #tpu.dot_dimension_numbers<[1], [0], [0], [1], [0, 0, 1, 1], [], []>} : vector<16x32xf32>, vector<32x16xf32>, vector<16x16xf32> -> vector<16x16xf32>
    %c1_205 = arith.constant 1 : index
    %c1_206 = arith.constant 1 : index
    %c2_207 = arith.constant 2 : index
    %c0_208 = arith.constant 0 : index
    %c0_209 = arith.constant 0 : index
    %272 = vector.load %arg4[%c1_205, %c1_206, %c2_207, %c0_208, %c0_209] : memref<2x2x3x1x16xf32, #tpu.memory_space<vmem>>, vector<1x1x1x1x16xf32>
    %273 = vector.shape_cast %272 : vector<1x1x1x1x16xf32> to vector<1x16xf32>
    %274 = vector.broadcast %273 : vector<1x16xf32> to vector<16x16xf32>
    %275 = arith.addf %271, %274 : vector<16x16xf32>
    %276 = vector.shape_cast %275 : vector<16x16xf32> to vector<2x8x16xf32>
    "tpu.trace_start"() <{level = 10 : i32, message = "bqd,bkd->bqk"}> : () -> ()
    %cst_210 = arith.constant dense<0.000000e+00> : vector<2x8x8xf32>
    %277 = tpu.matmul %260, %268, %cst_210 {dimension_numbers = #tpu.dot_dimension_numbers<[2], [2], [1], [1], [0, 0, 0, 1, 1, 1], [0], [0]>} : vector<2x8x16xf32>, vector<2x8x16xf32>, vector<2x8x8xf32> -> vector<2x8x8xf32>
    "tpu.trace_stop"() : () -> ()
    %278 = vector.broadcast %44 : vector<2x1x8xf32> to vector<2x8x8xf32>
    %279 = arith.addf %277, %278 : vector<2x8x8xf32>
    %cst_211 = arith.constant dense<0xFF800000> : vector<2x8xf32>
    %280 = vector.multi_reduction <maximumf>, %279, %cst_211 [2] : vector<2x8x8xf32> to vector<2x8xf32>
    %281 = vector.shape_cast %280 : vector<2x8xf32> to vector<2x8x1xf32>
    %282 = vector.broadcast %281 : vector<2x8x1xf32> to vector<2x8x8xf32>
    %283 = arith.subf %279, %282 : vector<2x8x8xf32>
    %284 = math.exp %283 : vector<2x8x8xf32>
    %cst_212 = arith.constant dense<0.000000e+00> : vector<2x8xf32>
    %285 = vector.multi_reduction <add>, %284, %cst_212 [2] : vector<2x8x8xf32> to vector<2x8xf32>
    %286 = vector.shape_cast %285 : vector<2x8xf32> to vector<2x8x1xf32>
    %287 = tpu.reciprocal %286 : vector<2x8x1xf32> -> vector<2x8x1xf32>
    %288 = vector.broadcast %287 : vector<2x8x1xf32> to vector<2x8x8xf32>
    %289 = arith.mulf %284, %288 : vector<2x8x8xf32>
    "tpu.trace_start"() <{level = 10 : i32, message = "bqk,bkd->bqd"}> : () -> ()
    %cst_213 = arith.constant dense<0.000000e+00> : vector<2x8x16xf32>
    %290 = tpu.matmul %289, %276, %cst_213 {dimension_numbers = #tpu.dot_dimension_numbers<[2], [1], [1], [2], [0, 0, 0, 1, 1, 2], [0], [0]>} : vector<2x8x8xf32>, vector<2x8x16xf32>, vector<2x8x16xf32> -> vector<2x8x16xf32>
    "tpu.trace_stop"() : () -> ()
    %291 = vector.shape_cast %290 : vector<2x8x16xf32> to vector<16x16xf32>
    %c1_214 = arith.constant 1 : index
    %c1_215 = arith.constant 1 : index
    %c3_216 = arith.constant 3 : index
    %c0_217 = arith.constant 0 : index
    %c0_218 = arith.constant 0 : index
    %292 = vector.load %arg3[%c1_214, %c1_215, %c3_216, %c0_217, %c0_218] : memref<2x2x4x32x16xf32, #tpu.memory_space<vmem>>, vector<1x1x1x32x16xf32>
    %293 = vector.shape_cast %292 : vector<1x1x1x32x16xf32> to vector<32x16xf32>
    %cst_219 = arith.constant dense<0.000000e+00> : vector<16x32xf32>
    %294 = tpu.matmul %291, %293, %cst_219 {dimension_numbers = #tpu.dot_dimension_numbers<[1], [1], [0], [0], [0, 0, 1, 0], [], []>} : vector<16x16xf32>, vector<32x16xf32>, vector<16x32xf32> -> vector<16x32xf32>
    %295 = arith.addf %252, %294 : vector<16x32xf32>
    %c1_220 = arith.constant 1 : index
    %c96_221 = arith.constant 96 : index
    %c0_222 = arith.constant 0 : index
    %296 = vector.load %arg5[%c1_220, %c96_221, %c0_222] : memref<2x104x64xf32, #tpu.memory_space<vmem>>, vector<1x1x32xf32>
    %297 = vector.shape_cast %296 : vector<1x1x32xf32> to vector<1x32xf32>
    %298 = vector.broadcast %297 : vector<1x32xf32> to vector<16x32xf32>
    %299 = arith.addf %295, %298 : vector<16x32xf32>
    %300 = arith.addf %299, %210 : vector<16x32xf32>
    %c1_223 = arith.constant 1 : index
    %c97_224 = arith.constant 97 : index
    %c0_225 = arith.constant 0 : index
    %301 = vector.load %arg5[%c1_223, %c97_224, %c0_225] : memref<2x104x64xf32, #tpu.memory_space<vmem>>, vector<1x1x32xf32>
    %302 = vector.shape_cast %301 : vector<1x1x32xf32> to vector<1x32xf32>
    %c1_226 = arith.constant 1 : index
    %c98_227 = arith.constant 98 : index
    %c0_228 = arith.constant 0 : index
    %303 = vector.load %arg5[%c1_226, %c98_227, %c0_228] : memref<2x104x64xf32, #tpu.memory_space<vmem>>, vector<1x1x32xf32>
    %304 = vector.shape_cast %303 : vector<1x1x32xf32> to vector<1x32xf32>
    %cst_229 = arith.constant dense<0.000000e+00> : vector<16xf32>
    %305 = vector.multi_reduction <add>, %300, %cst_229 [1] : vector<16x32xf32> to vector<16xf32>
    %306 = vector.shape_cast %305 : vector<16xf32> to vector<16x1xf32>
    %cst_230 = arith.constant 3.125000e-02 : f32
    %307 = vector.broadcast %cst_230 : f32 to vector<16x1xf32>
    %308 = arith.mulf %306, %307 : vector<16x1xf32>
    %309 = vector.broadcast %308 : vector<16x1xf32> to vector<16x32xf32>
    %310 = arith.subf %300, %309 : vector<16x32xf32>
    %311 = arith.mulf %310, %310 : vector<16x32xf32>
    %cst_231 = arith.constant dense<0.000000e+00> : vector<16xf32>
    %312 = vector.multi_reduction <add>, %311, %cst_231 [1] : vector<16x32xf32> to vector<16xf32>
    %313 = vector.shape_cast %312 : vector<16xf32> to vector<16x1xf32>
    %cst_232 = arith.constant 3.125000e-02 : f32
    %314 = vector.broadcast %cst_232 : f32 to vector<16x1xf32>
    %315 = arith.mulf %313, %314 : vector<16x1xf32>
    %cst_233 = arith.constant 9.99999974E-6 : f32
    %316 = vector.broadcast %cst_233 : f32 to vector<16x1xf32>
    %317 = arith.addf %315, %316 : vector<16x1xf32>
    %318 = math.rsqrt %317 : vector<16x1xf32>
    %319 = vector.broadcast %318 : vector<16x1xf32> to vector<16x32xf32>
    %320 = arith.mulf %310, %319 : vector<16x32xf32>
    %321 = vector.broadcast %302 : vector<1x32xf32> to vector<16x32xf32>
    %322 = arith.mulf %320, %321 : vector<16x32xf32>
    %323 = vector.broadcast %304 : vector<1x32xf32> to vector<16x32xf32>
    %324 = arith.addf %322, %323 : vector<16x32xf32>
    %c1_234 = arith.constant 1 : index
    %c0_235 = arith.constant 0 : index
    %c0_236 = arith.constant 0 : index
    %325 = vector.load %arg5[%c1_234, %c0_235, %c0_236] : memref<2x104x64xf32, #tpu.memory_space<vmem>>, vector<1x32x64xf32>
    %326 = vector.shape_cast %325 : vector<1x32x64xf32> to vector<32x64xf32>
    %c1_237 = arith.constant 1 : index
    %c32_238 = arith.constant 32 : index
    %c0_239 = arith.constant 0 : index
    %327 = vector.load %arg5[%c1_237, %c32_238, %c0_239] : memref<2x104x64xf32, #tpu.memory_space<vmem>>, vector<1x64x32xf32>
    %328 = vector.shape_cast %327 : vector<1x64x32xf32> to vector<64x32xf32>
    %cst_240 = arith.constant dense<0.000000e+00> : vector<16x64xf32>
    %329 = tpu.matmul %324, %326, %cst_240 {dimension_numbers = #tpu.dot_dimension_numbers<[1], [0], [0], [1], [0, 0, 1, 1], [], []>} : vector<16x32xf32>, vector<32x64xf32>, vector<16x64xf32> -> vector<16x64xf32>
    %c1_241 = arith.constant 1 : index
    %c99_242 = arith.constant 99 : index
    %c0_243 = arith.constant 0 : index
    %330 = vector.load %arg5[%c1_241, %c99_242, %c0_243] : memref<2x104x64xf32, #tpu.memory_space<vmem>>, vector<1x1x64xf32>
    %331 = vector.shape_cast %330 : vector<1x1x64xf32> to vector<1x64xf32>
    %332 = vector.broadcast %331 : vector<1x64xf32> to vector<16x64xf32>
    %333 = arith.addf %329, %332 : vector<16x64xf32>
    %cst_244 = arith.constant 5.000000e-01 : f32
    %334 = vector.broadcast %cst_244 : f32 to vector<16x64xf32>
    %335 = arith.mulf %334, %333 : vector<16x64xf32>
    %cst_245 = arith.constant 4.471500e-02 : f32
    %336 = vector.broadcast %cst_245 : f32 to vector<16x64xf32>
    %337 = arith.mulf %336, %333 : vector<16x64xf32>
    %338 = arith.mulf %337, %333 : vector<16x64xf32>
    %339 = arith.mulf %338, %333 : vector<16x64xf32>
    %340 = arith.addf %333, %339 : vector<16x64xf32>
    %cst_246 = arith.constant 0.797884583 : f32
    %341 = vector.broadcast %cst_246 : f32 to vector<16x64xf32>
    %342 = arith.mulf %341, %340 : vector<16x64xf32>
    %343 = math.tanh %342 : vector<16x64xf32>
    %cst_247 = arith.constant 1.000000e+00 : f32
    %344 = vector.broadcast %cst_247 : f32 to vector<16x64xf32>
    %345 = arith.addf %344, %343 : vector<16x64xf32>
    %346 = arith.mulf %335, %345 : vector<16x64xf32>
    %cst_248 = arith.constant dense<0.000000e+00> : vector<16x32xf32>
    %347 = tpu.matmul %346, %328, %cst_248 {dimension_numbers = #tpu.dot_dimension_numbers<[1], [0], [0], [1], [0, 0, 1, 1], [], []>} : vector<16x64xf32>, vector<64x32xf32>, vector<16x32xf32> -> vector<16x32xf32>
    %c1_249 = arith.constant 1 : index
    %c100_250 = arith.constant 100 : index
    %c0_251 = arith.constant 0 : index
    %348 = vector.load %arg5[%c1_249, %c100_250, %c0_251] : memref<2x104x64xf32, #tpu.memory_space<vmem>>, vector<1x1x32xf32>
    %349 = vector.shape_cast %348 : vector<1x1x32xf32> to vector<1x32xf32>
    %350 = vector.broadcast %349 : vector<1x32xf32> to vector<16x32xf32>
    %351 = arith.addf %347, %350 : vector<16x32xf32>
    %352 = arith.addf %351, %324 : vector<16x32xf32>
    %c1_252 = arith.constant 1 : index
    %c101_253 = arith.constant 101 : index
    %c0_254 = arith.constant 0 : index
    %353 = vector.load %arg5[%c1_252, %c101_253, %c0_254] : memref<2x104x64xf32, #tpu.memory_space<vmem>>, vector<1x1x32xf32>
    %354 = vector.shape_cast %353 : vector<1x1x32xf32> to vector<1x32xf32>
    %c1_255 = arith.constant 1 : index
    %c102_256 = arith.constant 102 : index
    %c0_257 = arith.constant 0 : index
    %355 = vector.load %arg5[%c1_255, %c102_256, %c0_257] : memref<2x104x64xf32, #tpu.memory_space<vmem>>, vector<1x1x32xf32>
    %356 = vector.shape_cast %355 : vector<1x1x32xf32> to vector<1x32xf32>
    %cst_258 = arith.constant dense<0.000000e+00> : vector<16xf32>
    %357 = vector.multi_reduction <add>, %352, %cst_258 [1] : vector<16x32xf32> to vector<16xf32>
    %358 = vector.shape_cast %357 : vector<16xf32> to vector<16x1xf32>
    %cst_259 = arith.constant 3.125000e-02 : f32
    %359 = vector.broadcast %cst_259 : f32 to vector<16x1xf32>
    %360 = arith.mulf %358, %359 : vector<16x1xf32>
    %361 = vector.broadcast %360 : vector<16x1xf32> to vector<16x32xf32>
    %362 = arith.subf %352, %361 : vector<16x32xf32>
    %363 = arith.mulf %362, %362 : vector<16x32xf32>
    %cst_260 = arith.constant dense<0.000000e+00> : vector<16xf32>
    %364 = vector.multi_reduction <add>, %363, %cst_260 [1] : vector<16x32xf32> to vector<16xf32>
    %365 = vector.shape_cast %364 : vector<16xf32> to vector<16x1xf32>
    %cst_261 = arith.constant 3.125000e-02 : f32
    %366 = vector.broadcast %cst_261 : f32 to vector<16x1xf32>
    %367 = arith.mulf %365, %366 : vector<16x1xf32>
    %cst_262 = arith.constant 9.99999974E-6 : f32
    %368 = vector.broadcast %cst_262 : f32 to vector<16x1xf32>
    %369 = arith.addf %367, %368 : vector<16x1xf32>
    %370 = math.rsqrt %369 : vector<16x1xf32>
    %371 = vector.broadcast %370 : vector<16x1xf32> to vector<16x32xf32>
    %372 = arith.mulf %362, %371 : vector<16x32xf32>
    %373 = vector.broadcast %354 : vector<1x32xf32> to vector<16x32xf32>
    %374 = arith.mulf %372, %373 : vector<16x32xf32>
    %375 = vector.broadcast %356 : vector<1x32xf32> to vector<16x32xf32>
    %376 = arith.addf %374, %375 : vector<16x32xf32>
    %377 = vector.shape_cast %376 : vector<16x32xf32> to vector<2x8x32xf32>
    %378 = vector.extract_strided_slice %377 {offsets = [0, 0, 0], sizes = [2, 1, 32], strides = [1, 1, 1]} : vector<2x8x32xf32> to vector<2x1x32xf32>
    %379 = vector.shape_cast %378 : vector<2x1x32xf32> to vector<2x32xf32>
    %c0_263 = arith.constant 0 : index
    %c768 = arith.constant 768 : index
    %380 = vector.load %arg6[%c0_263, %c768] : memref<40x800xf32, #tpu.memory_space<vmem>>, vector<32x32xf32>
    %c33 = arith.constant 33 : index
    %c0_264 = arith.constant 0 : index
    %381 = vector.load %arg6[%c33, %c0_264] : memref<40x800xf32, #tpu.memory_space<vmem>>, vector<1x32xf32>
    %cst_265 = arith.constant dense<0.000000e+00> : vector<2x32xf32>
    %382 = tpu.matmul %379, %380, %cst_265 {dimension_numbers = #tpu.dot_dimension_numbers<[1], [0], [0], [1], [0, 0, 1, 1], [], []>} : vector<2x32xf32>, vector<32x32xf32>, vector<2x32xf32> -> vector<2x32xf32>
    %383 = vector.broadcast %381 : vector<1x32xf32> to vector<2x32xf32>
    %384 = arith.addf %382, %383 : vector<2x32xf32>
    %385 = math.tanh %384 : vector<2x32xf32>
    %c0_266 = arith.constant 0 : index
    %c0_267 = arith.constant 0 : index
    %386 = vector.load %arg6[%c0_266, %c0_267] : memref<40x800xf32, #tpu.memory_space<vmem>>, vector<32x768xf32>
    %c32_268 = arith.constant 32 : index
    %c0_269 = arith.constant 0 : index
    %387 = vector.load %arg6[%c32_268, %c0_269] : memref<40x800xf32, #tpu.memory_space<vmem>>, vector<1x768xf32>
    %cst_270 = arith.constant dense<0.000000e+00> : vector<2x768xf32>
    %388 = tpu.matmul %385, %386, %cst_270 {dimension_numbers = #tpu.dot_dimension_numbers<[1], [0], [0], [1], [0, 0, 1, 1], [], []>} : vector<2x32xf32>, vector<32x768xf32>, vector<2x768xf32> -> vector<2x768xf32>
    %389 = vector.broadcast %387 : vector<1x768xf32> to vector<2x768xf32>
    %390 = arith.addf %388, %389 : vector<2x768xf32>
    %cst_271 = arith.constant 0.000000e+00 : f32
    %391 = vector.broadcast %cst_271 : f32 to vector<2x768xf32>
    %392 = arith.maximumf %390, %391 : vector<2x768xf32>
    %c34 = arith.constant 34 : index
    %c0_272 = arith.constant 0 : index
    %393 = vector.load %arg6[%c34, %c0_272] : memref<40x800xf32, #tpu.memory_space<vmem>>, vector<1x8xf32>
    %c0_273 = arith.constant 0 : index
    %c0_274 = arith.constant 0 : index
    %394 = vector.load %arg7[%c0_273, %c0_274] : memref<768x8xf32, #tpu.memory_space<vmem>>, vector<768x8xf32>
    %cst_275 = arith.constant dense<0.000000e+00> : vector<2x8xf32>
    %395 = tpu.matmul %392, %394, %cst_275 {dimension_numbers = #tpu.dot_dimension_numbers<[1], [0], [0], [1], [0, 0, 1, 1], [], []>} : vector<2x768xf32>, vector<768x8xf32>, vector<2x8xf32> -> vector<2x8xf32>
    %396 = vector.broadcast %393 : vector<1x8xf32> to vector<2x8xf32>
    %397 = arith.addf %395, %396 : vector<2x8xf32>
    %c0_276 = arith.constant 0 : index
    %c0_277 = arith.constant 0 : index
    %398 = vector.load %arg8[%c0_276, %c0_277] : memref<2x8xf32, #tpu.memory_space<vmem>>, vector<2x8xf32>
    tpu.vector_store %arg8[%c0_276, %c0_277], %397 {strides = array<i32>} : memref<2x8xf32, #tpu.memory_space<vmem>>, vector<2x8xf32>,
    return
  }
}

</mosaic_0001>

<bundles_post_ra>
// kernel: forward.1
= control target key start
LH: loop header
LB: loop body
LE: loop exit
PB: predicated region body
PF: predicated region fallthrough
CT: control target
= control target key end

     0   :  { %v5546_v2 = vmov 0   ;;  %s6684_s0 = inlined_call_operand.vmem [shape: s32[16,1], index: 0, kind: input, shape index: {}]   ;;  %s6685_s1 = inlined_call_operand.vmem [shape: f32[2,8], index: 1, kind: input, shape index: {}]   ;;  %s6686_s2 = inlined_call_operand.vmem [shape: f32[144,32], index: 2, kind: input, shape index: {}]   ;;  %s6687_s3 = inlined_call_operand.vmem [shape: f32[2,2,4,32,16], index: 3, kind: input, shape index: {}]   ;;  %s6688_s4 = inlined_call_operand.vmem [shape: f32[2,2,3,1,16], index: 4, kind: input, shape index: {}]   ;;  %s6689_s5 = inlined_call_operand.vmem [shape: f32[2,104,64], index: 5, kind: input, shape index: {}]   ;;  %s6690_s6 = inlined_call_operand.vmem [shape: f32[40,800], index: 6, kind: input, shape index: {}]   ;;  %s6691_s7 = inlined_call_operand.vmem [shape: f32[768,8], index: 7, kind: input, shape index: {}]   ;;  %s6692_s8 = inlined_call_operand.hbm [shape: f32[2,8], index: 8, kind: output, shape index: {}]  }
   0x1   :  { %v30_v0 = vld [vmem:[%s6684_s0] sm:$0xff]  ;;  %5459 = vset.pattern.permute.xlu0 %v5546_v2  ;;  %v47_v3 = vld [vmem:[%s6686_s2 + $0x8] sm:$0xff]  ;;  %v48_v4 = vld [vmem:[%s6686_s2 + $0x10] sm:$0xff] }
   0x2   :  { %v46_v1 = vld [vmem:[%s6686_s2] sm:$0xff]  ;;  %v49_v5 = vld [vmem:[%s6686_s2 + $0x18] sm:$0xff]  ;;  %35 = vperm.xlu0 %5459, %v30_v0   ;;  %v31_v8 = vld [vmem:[%s6684_s0 + $0x8] sm:$0xff] }
   0x3   :  { %v5098_v6 = vpack.c.bf16 %v47_v3, %v46_v1  ;;  %v5102_v7 = vpack.c.bf16 %v49_v5, %v48_v4  ;;  %v50_v9 = vld [vmem:[%s6686_s2 + $0x20] sm:$0xff]  ;;  %v51_v10 = vld [vmem:[%s6686_s2 + $0x28] sm:$0xff] }
   0x4   :  { %v5106_v11 = vpack.c.bf16 %v51_v10, %v50_v9 }
   0x5   :  { %5099 = vmatprep.subr.bf16.mxu0 %v5098_v6 }
   0x6   :  { %5101 = vmatpush3.bf16.msra.mxu0 %v5098_v6  ;;  %38 = vperm.xlu0 %5459, %v31_v8  }
   0x7   :  { %5103 = vmatprep.subr.bf16.mxu0 %v5102_v7 }
   0x8   :  { %13 = vsyncpa [#allocation3], 0  ;;  %v52_v12 = vld [vmem:[%s6686_s2 + $0x30] sm:$0xff]  ;;  %v53_v13 = vld [vmem:[%s6686_s2 + $0x38] sm:$0xff]  ;;  %v32_v27 = vlaneseq  ;;  %v5547_v30 = vmov 1.0   ;;  %vm149_vm2 = vcmask 261120  }
   0x9   :  { %v5110_v14 = vpack.c.bf16 %v53_v13, %v52_v12  ;;  %v54_v15 = vld [vmem:[%s6686_s2 + $0x40] sm:$0xff]  ;;  %v55_v16 = vld [vmem:[%s6686_s2 + $0x48] sm:$0xff]  ;;  %v56_v18 = vld [vmem:[%s6686_s2 + $0x50] sm:$0xff]  ;;  %vm5549_vm3 = vmmov 0   ;;  %vm492_vm4 = vcmask 130048   ;;  %vm645_vm5 = vcmask 64512  }
   0xa   :  { %5105 = vmatpush3.bf16.msra.mxu0 %v5102_v7  ;;  %v5114_v17 = vpack.c.bf16 %v55_v16, %v54_v15  ;;  %v57_v19 = vld [vmem:[%s6686_s2 + $0x58] sm:$0xff]  ;;  %v58_v21 = vld [vmem:[%s6686_s2 + $0x60] sm:$0xff]  ;;  %v59_v22 = vld [vmem:[%s6686_s2 + $0x68] sm:$0xff]  ;;  %v33_v28 = vand.u32 127, %v32_v27  ;;  %vm1764_vm7 = vcmask 523264   ;;  %vm3560_vm8 = vcmask 1041409  }
   0xb   :  { %5107 = vmatprep.subr.bf16.mxu0 %v5106_v11  ;;  %v5118_v20 = vpack.c.bf16 %v57_v19, %v56_v18  ;;  %v5122_v23 = vpack.c.bf16 %v59_v22, %v58_v21  ;;  %v60_v24 = vld [vmem:[%s6686_s2 + $0x70] sm:$0xff]  ;;  %v61_v25 = vld [vmem:[%s6686_s2 + $0x78] sm:$0xff]  ;;  %v137_v32 = vld [vmem:[%s6686_s2 + $0x80] sm:$0xff]  ;;  %v5548_v22 = vmov 0.0   ;;  %vm4223_vm9 = vcmask 58368  }
   0xc   :  { %v5126_v26 = vpack.c.bf16 %v61_v25, %v60_v24  ;;  %v4243_v35 = vld [vmem:[%s6686_s2 + $0x88] ss:$0 sm:$0xff]  ;;  %v4249_v52 = vld [vmem:[%s6687_s3 + $0x20] sm:$0xff]  ;;  %v4251_v58 = vld [vmem:[%s6687_s3 + $0x30] sm:$0xff] }
   0xd   :  { %v4250_v53 = vld [vmem:[%s6687_s3 + $0x28] sm:$0xff]  ;;  %v214_v55 = vld [vmem:[%s6687_s3] sm:$0xff]  ;;  %v4252_v59 = vld [vmem:[%s6687_s3 + $0x38] sm:$0xff] }
   0xe   :  { %5109 = vmatpush3.bf16.msra.mxu0 %v5106_v11  ;;  %v5138_v54 = vpack.c.bf16 %v4250_v53, %v4249_v52  ;;  %v215_v56 = vld [vmem:[%s6687_s3 + $0x8] sm:$0xff]  ;;  %v5142_v60 = vpack.c.bf16 %v4252_v59, %v4251_v58  ;;  %v216_v61 = vld [vmem:[%s6687_s3 + $0x10] sm:$0xff]  ;;  %v217_v62 = vld [vmem:[%s6687_s3 + $0x18] sm:$0xff] }
   0xf   :  { %5111 = vmatprep.subr.bf16.mxu0 %v5110_v14  ;;  %v5130_v57 = vpack.c.bf16 %v215_v56, %v214_v55  ;;  %v5134_v63 = vpack.c.bf16 %v217_v62, %v216_v61  ;;  %v4257_v0 = vld [vmem:[%s6687_s3 + $0x40] sm:$0xff]  ;;  %v4258_v1 = vld [vmem:[%s6687_s3 + $0x48] sm:$0xff]  ;;  %v4260_v18 = vld [vmem:[%s6687_s3 + $0x58] sm:$0xff] }
  0x10   :  { %5139 = vmatprep.subr.bf16.mxu1 %v5138_v54  ;;  %v5146_v2 = vpack.c.bf16 %v4258_v1, %v4257_v0  ;;  %v4244_v10 = vld [vmem:[%s6686_s2 + $0x89] ss:$0 sm:$0xff]  ;;  %v4245_v12 = vld [vmem:[%s6686_s2 + $0x8a] ss:$0 sm:$0xff]  ;;  %vm5861_vm6 = vmpackc.low %vm492_vm4, %vm492_vm4 }
  0x11   :  { %5141 = vmatpush3.bf16.msra.mxu1 %v5138_v54 }
  0x12   :  { %5113 = vmatpush3.bf16.msra.mxu0 %v5110_v14  ;;  %5143 = vmatprep.subr.bf16.mxu1 %v5142_v60 }
  0x13   :  { %5115 = vmatprep.subr.bf16.mxu0 %v5114_v17 }
  0x15   :  { %5145 = vmatpush3.bf16.msra.mxu1 %v5142_v60 }
  0x16   :  { %5117 = vmatpush3.bf16.msra.mxu0 %v5114_v17  ;;  %5147 = vmatprep.subr.bf16.mxu1 %v5146_v2  ;;  %v4259_v17 = vld [vmem:[%s6687_s3 + $0x50] sm:$0xff] }
  0x17   :  { %5119 = vmatprep.subr.bf16.mxu0 %v5118_v20  ;;  %v5150_v21 = vpack.c.bf16 %v4260_v18, %v4259_v17  ;;  %v4286_v17 = vld [vmem:[%s6687_s3 + $0xb8] sm:$0xff] }
  0x1a   :  { %5121 = vmatpush3.bf16.msra.mxu0 %v5118_v20 }
  0x1b   :  { %5123 = vmatprep.subr.bf16.mxu0 %v5122_v23 }
  0x1e   :  { %5125 = vmatpush3.bf16.msra.mxu0 %v5122_v23  ;;  %v4254_v23 = vld [vmem:[%s6688_s4 + $0x1] ss:$0 sm:$0xff] }
  0x1f   :  { %5127 = vmatprep.subr.bf16.mxu0 %v5126_v26 }
  0x22   :  { %5129 = vmatpush3.bf16.msra.mxu0 %v5126_v26  ;;  %v4246_v26 = vld [vmem:[%s6688_s4] ss:$0 sm:$0xff] }
  0x23   :  { %5131 = vmatprep.subr.bf16.mxu0 %v5130_v57 }
  0x81   :  { %v36_v29 = vpop.permute.xlu0 %35 }
  0x82   :  { %vm40_vm0 = vcmp.eq.s32.totalorder %v33_v28, %v36_v29 }
  0x83   :  { %4768 = vmatprep.mubr.msk.f32.mxu0 %vm40_vm0, %v5547_v30 }
  0x85   :  { %v39_v31 = vpop.permute.xlu0 %38 }
  0x86   :  { %vm41_vm1 = vcmp.eq.s32.totalorder %v33_v28, %v39_v31 }
  0x87   :  { %4769 = vmatmul.mubr.msk.f32.vlgmr.msra.gmra.mrb[0].mxu0 %vm41_vm1, %v5547_v30 }
  0x88   :  { %5133 = vmatpush3.bf16.msra.mxu0 %v5130_v57 }
  0x89   :  { %5135 = vmatprep.subr.bf16.mxu0 %v5134_v63 }
  0x8c   :  { %5137 = vmatpush3.bf16.msra.mxu0 %v5134_v63 }
  0x8d   :  { %4804 = vmatprep.subr.mxu0 %v5548_v22 }
 0x15a   :  { %v4770_v33 = vpop.f32.mrb[0].mxu0 }
 0x15b   :  { %v128_v34 = vpop.f32.mrb[1].mxu0  ;;  %v140_v36 = vadd.f32 %v4770_v33, %v137_v32 }
 0x15c   :  { %v139_v37 = vadd.f32 %v137_v32, %v128_v34  ;;  %v4262_v34 = vld [vmem:[%s6688_s4 + $0x2] ss:$0 sm:$0xff] }
 0x15d   :  { %v146_v40 = vadd.f32 %v4243_v35, %v140_v36 }
 0x15e   :  { %v145_v38 = vadd.f32 %v4243_v35, %v139_v37 }
 0x15f   :  { %v153_v41 = vsel %vm149_vm2, %v146_v40, 0.0 }
 0x160   :  { %v150_v39 = vsel %vm149_vm2, %v145_v38, 0.0 }
 0x161   :  { %151 = vadd.xlane.f32.xlu1 %v150_v39  ;;  %v5550_v39 = vmov 1966171168  }
 0x165   :  { %154 = vadd.xlane.f32.xlu1 %v153_v41  ;;  %v188_v41 = vld [vmem:[%s6685_s1] sm:$0x3] }
 0x1ee   :  { %v152_v42 = vpop.xlane.xlu1 %151 }
 0x1ef   :  { %v156_v43 = vmul.f32 0.03125, %v152_v42  ;;  %v5750_v42 = vshrl.u32 %v32_v27, 7 }
 0x1f1   :  { %v158_v44 = vsub.f32 %v145_v38, %v156_v43  ;;  %v189_v43 = vsub.f32 1.0, %v188_v41 }
 0x1f2   :  { %v155_v45 = vpop.xlane.xlu1 %154 }
 0x1f3   :  { %v157_v46 = vmul.f32 0.03125, %v155_v45  ;;  %v160_v47 = vmul.f32 %v158_v44, %v158_v44  ;;  %v190_v45 = vmul.f32 -1e+09, %v189_v43 }
 0x1f5   :  { %v159_v48 = vsub.f32 %v146_v40, %v157_v46  ;;  %v162_v49 = vsel %vm149_vm2, %v160_v47, 0.0  ;;  %v193_v40 = vunpack.c.l.s4 %v5550_v39  ;;  %v4288_v39 = vld [vmem:[%s6688_s4 + $0x4] ss:$0 sm:$0xff] }
 0x1f6   :  { %163 = vadd.xlane.f32.xlu0 %v162_v49 }
 0x1f7   :  { %v161_v50 = vmul.f32 %v159_v48, %v159_v48 }
 0x1f9   :  { %v165_v51 = vsel %vm149_vm2, %v161_v50, 0.0  ;;  %v5754_v50 = vsub.s32 0, %v5750_v42 }
 0x1fa   :  { %166 = vadd.xlane.f32.xlu1 %v165_v51 }
 0x283   :  { %v164_v3 = vpop.xlane.xlu0 %163 }
 0x284   :  { %v168_v4 = vmul.f32 0.03125, %v164_v3 }
 0x286   :  { %v170_v5 = vadd.f32 1e-05, %v168_v4 }
 0x287   :  { %v167_v6 = vpop.xlane.xlu1 %166 }
 0x288   :  { %5460 = vrsqrt.f32 %v170_v5  ;;  %v169_v7 = vmul.f32 0.03125, %v167_v6 }
 0x28a   :  { %v171_v8 = vadd.f32 1e-05, %v169_v7  ;;  %v4283_v7 = vld [vmem:[%s6687_s3 + $0xa0] sm:$0xff] }
 0x28c   :  { %5462 = vrsqrt.f32 %v171_v8  ;;  %v4284_v8 = vld [vmem:[%s6687_s3 + $0xa8] sm:$0xff] }
 0x292   :  { %v5461_v9 = vpop.eup %5460 }
 0x293   :  { %v174_v11 = vmul.f32 %v5461_v9, %v158_v44  ;;  %v194_v44 = vunpack.c.0.s8 %v193_v40  ;;  %v5162_v9 = vpack.c.bf16 %v4284_v8, %v4283_v7 }
 0x295   :  { %v180_v13 = vmul.f32 %v4244_v10, %v174_v11  ;;  %v197_v46 = vsub.s32 %v194_v44, %v5750_v42  ;;  %v4276_v11 = vld [vmem:[%s6687_s3 + $0x88] sm:$0xff]  ;;  %v4280_v44 = vld [vmem:[%s6688_s4 + $0x3] ss:$0 sm:$0xff] }
 0x296   :  { %v5463_v14 = vpop.eup %5462 }
 0x297   :  { %v5699_v15 = vadd.f32 %v4245_v12, %v180_v13  ;;  %v175_v16 = vmul.f32 %v5463_v14, %v159_v48  ;;  %v198_v47 = vrot.slane %v190_v45, %v197_v46 }
 0x299   :  { %v181_v19 = vmul.f32 %v4244_v10, %v175_v16  ;;  %4779 = vmatprep.mubr.msk.f32.mxu0 %vm149_vm2, %v5699_v15  ;;  %4790 = vmatprep.mubr.msk.f32.mxu1 %vm149_vm2, %v5699_v15  ;;  %v199_v48 = vcombine.high %v198_v47, %v198_v47  ;;  %v206_v51 = vrot.slane %v198_v47, %v197_v46  ;;  %v4275_v10 = vld [vmem:[%s6687_s3 + $0x80] sm:$0xff]  ;;  %v4285_v16 = vld [vmem:[%s6687_s3 + $0xb0] sm:$0xff] }
 0x29b   :  { %v5711_v20 = vadd.f32 %v4245_v12, %v181_v19  ;;  %v213_v49 = vrot.slane %v199_v48, %v197_v46  ;;  %v5760_v53 = vrot.slane %v206_v51, %v5754_v50  ;;  %v5154_v12 = vpack.c.bf16 %v4276_v11, %v4275_v10  ;;  %v4296_v51 = vld [vmem:[%s6688_s4 + $0x5] ss:$0 sm:$0xff] }
 0x29c   :  { %v4305_v11 = vld [vmem:[%s6687_s3 + $0xe0] sm:$0xff] }
 0x29d   :  { %4780 = vmatmul.mubr.msk.f32.vlgmr.msra.gmra.mrb[2].mxu0 %vm149_vm2, %v5711_v20  ;;  %4791 = vmatmul.mubr.msk.f32.vlgmr.msra.gmra.mrb[0].mxu1 %vm149_vm2, %v5711_v20  ;;  %v5757_v52 = vrot.slane %v213_v49, %v5754_v50 }
 0x29e   :  { %5149 = vmatpush3.bf16.msra.mxu1 %v5146_v2  ;;  %4801 = vmatprep.mubr.msk.f32.mxu1 %vm149_vm2, %v5699_v15 }
 0x29f   :  { %5151 = vmatprep.subr.bf16.mxu1 %v5150_v21  ;;  %4806 = vmatprep.mubr.msk.f32.mxu0 %vm5549_vm3, %v5548_v22 }
 0x2a2   :  { %5153 = vmatpush3.bf16.msra.mxu1 %v5150_v21  ;;  %v5166_v21 = vpack.c.bf16 %v4286_v17, %v4285_v16 }
 0x2a3   :  { %4809 = vmatprep.subr.mxu1 %v5548_v22 }
 0x2a5   :  { %4802 = vmatmul.mubr.msk.f32.vlgmr.msra.gmra.mrb[2].mxu1 %vm149_vm2, %v5711_v20 }
 0x2a6   :  { %4811 = vmatprep.mubr.msk.f32.mxu1 %vm5549_vm3, %v5548_v22 }
 0x370   :  { %v4781_v24 = vpop.f32.mrb[2].mxu0  ;;  %v4792_v25 = vpop.f32.mrb[0].mxu1 }
 0x371   :  { %v391_v28 = vadd.f32 %v4792_v25, %v4254_v23  ;;  %v297_v29 = vpop.f32.mrb[3].mxu0  ;;  %v385_v30 = vpop.f32.mrb[1].mxu1  ;;  %v303_v32 = vadd.f32 %v4781_v24, %v4246_v26  ;;  %v4278_v24 = vld [vmem:[%s6687_s3 + $0x98] sm:$0xff] }
 0x372   :  { %v386_v31 = vadd.f32 %v4254_v23, %v385_v30  ;;  %v298_v33 = vadd.f32 %v4246_v26, %v297_v29  ;;  %v4277_v23 = vld [vmem:[%s6687_s3 + $0x90] sm:$0xff]  ;;  %v4291_v29 = vld [vmem:[%s6687_s3 + $0xc0] sm:$0xff]  ;;  %v4292_v30 = vld [vmem:[%s6687_s3 + $0xc8] sm:$0xff] }
 0x373   :  { %4810 = vmatpush3.xpose.msk.msra.mxu1 %vm492_vm4, %v391_v28  ;;  %v5158_v28 = vpack.c.bf16 %v4278_v24, %v4277_v23 }
 0x374   :  { %4805 = vmatpush3.xpose.msk.msra.mxu0 %vm492_vm4, %v386_v31  ;;  %4819 = vmatprep.subr.mxu1 %v5548_v22  ;;  %v5170_v31 = vpack.c.bf16 %v4292_v30, %v4291_v29  ;;  %v4272_v29 = vld [vmem:[%s6687_s3 + $0x68] sm:$0xff] }
 0x375   :  { %4814 = vmatprep.subr.mxu0 %v5548_v22 }
 0x376   :  { %4812 = vmatmul.mubr.msk.f32.vlgmr.msra.gmra.mrb[4].mxu1 %vm492_vm4, %v303_v32  ;;  %v4293_v32 = vld [vmem:[%s6687_s3 + $0xd0] sm:$0xff] }
 0x377   :  { %4807 = vmatmul.mubr.msk.f32.vlgmr.msra.gmra.mrb[4].mxu0 %vm492_vm4, %v298_v33  ;;  %4821 = vmatprep.mubr.msk.f32.mxu1 %vm5549_vm3, %v5548_v22  ;;  %v4294_v33 = vld [vmem:[%s6687_s3 + $0xd8] sm:$0xff] }
 0x378   :  { %v4803_v35 = vpop.f32.mrb[2].mxu1  ;;  %4816 = vmatprep.mubr.msk.f32.mxu0 %vm5549_vm3, %v5548_v22 }
 0x379   :  { %v479_v36 = vadd.f32 %v4803_v35, %v4262_v34  ;;  %v473_v37 = vpop.f32.mrb[3].mxu1 }
 0x37a   :  { %v474_v38 = vadd.f32 %v4262_v34, %v473_v37  ;;  %v5174_v34 = vpack.c.bf16 %v4294_v33, %v4293_v32  ;;  %v4273_v32 = vld [vmem:[%s6687_s3 + $0x70] sm:$0xff]  ;;  %v4274_v33 = vld [vmem:[%s6687_s3 + $0x78] sm:$0xff] }
 0x37b   :  { %4820 = vmatpush3.msra.mxu1 %v479_v36 }
 0x37c   :  { %4815 = vmatpush3.msra.mxu0 %v474_v38  ;;  %5163 = vmatprep.subr.bf16.mxu1 %v5162_v9 }
 0x37d   :  { %5155 = vmatprep.subr.bf16.mxu0 %v5154_v12 }
 0x449   :  { %v641_v27 = vpop.f32.mrb[4].mxu1 }
 0x44a   :  { %v642_v54 = vadd.f32 %v641_v27, %v5757_v52  ;;  %v565_v55 = vpop.f32.mrb[4].mxu0  ;;  %v4813_v56 = vpop.f32.mrb[5].mxu1 }
 0x44b   :  { %v4808_v57 = vpop.f32.mrb[5].mxu0  ;;  %v566_v58 = vadd.f32 %v565_v55, %v5760_v53 }
 0x44c   :  { %v649_v59 = vsel %vm645_vm5, %v642_v54, -inf }
 0x44d   :  { %650 = vmax.xlane.f32.xlu1 %v649_v59  ;;  %v646_v60 = vsel %vm645_vm5, %v566_v58, -inf }
 0x451   :  { %647 = vmax.xlane.f32.xlu1 %v646_v60 }
 0x4da   :  { %v651_v61 = vpop.xlane.xlu1 %650 }
 0x4db   :  { %v653_v62 = vsub.f32 %v642_v54, %v651_v61 }
 0x4dd   :  { %v656_v63 = vmul.f32 1.442695, %v653_v62 }
 0x4de   :  { %v648_v0 = vpop.xlane.xlu1 %647 }
 0x4df   :  { %5464 = vpow2.f32 %v656_v63  ;;  %v652_v1 = vsub.f32 %v566_v58, %v648_v0 }
 0x4e1   :  { %v654_v2 = vmul.f32 1.442695, %v652_v1 }
 0x4e3   :  { %5466 = vpow2.f32 %v654_v2 }
 0x4e9   :  { %v5465_v3 = vpop.eup %5464 }
 0x4ea   :  { %v661_v4 = vsel %vm645_vm5, %v5465_v3, 0.0 }
 0x4eb   :  { %662 = vadd.xlane.f32.xlu1 %v661_v4 }
 0x4ed   :  { %v5467_v5 = vpop.eup %5466 }
 0x4ee   :  { %v658_v6 = vsel %vm645_vm5, %v5467_v5, 0.0 }
 0x4ef   :  { %659 = vadd.xlane.f32.xlu1 %v658_v6 }
 0x578   :  { %v663_v13 = vpop.xlane.xlu1 %662 }
 0x579   :  { %5468 = vrcp.f32 %v663_v13 }
 0x57c   :  { %v660_v14 = vpop.xlane.xlu1 %659 }
 0x57d   :  { %5470 = vrcp.f32 %v660_v14 }
 0x583   :  { %v5469_v18 = vpop.eup %5468 }
 0x584   :  { %v667_v19 = vmul.f32 %v5469_v18, %v5465_v3  ;;  %v4307_v18 = vld [vmem:[%s6687_s3 + $0xf0] sm:$0xff] }
 0x586   :  { %4822 = vmatmul.mubr.msk.f32.vlgmr.msra.gmra.mrb[6].mxu1 %vm645_vm5, %v667_v19  ;;  %v4308_v19 = vld [vmem:[%s6687_s3 + $0xf8] sm:$0xff] }
 0x587   :  { %v5471_v25 = vpop.eup %5470  ;;  %5165 = vmatpush3.bf16.msra.mxu1 %v5162_v9  ;;  %4843 = vmatprep.mubr.msk.f32.mxu1 %vm149_vm2, %v5699_v15  ;;  %v5184_v24 = vpack.c.bf16 %v4308_v19, %v4307_v18  ;;  %v1647_v18 = vld [vmem:[%s6689_s5 + $0x20] sm:$0xff]  ;;  %v1648_v19 = vld [vmem:[%s6689_s5 + $0x28] sm:$0xff] }
 0x588   :  { %v666_v26 = vmul.f32 %v5471_v25, %v5467_v5  ;;  %5167 = vmatprep.subr.bf16.mxu1 %v5166_v21 }
 0x58a   :  { %4817 = vmatmul.mubr.msk.f32.vlgmr.msra.gmra.mrb[6].mxu0 %vm645_vm5, %v666_v26 }
 0x58b   :  { %5157 = vmatpush3.bf16.msra.mxu0 %v5154_v12  ;;  %5169 = vmatpush3.bf16.msra.mxu1 %v5166_v21  ;;  %v4306_v12 = vld [vmem:[%s6687_s3 + $0xe8] sm:$0xff] }
 0x58c   :  { %4832 = vmatprep.mubr.msk.f32.mxu0 %vm149_vm2, %v5699_v15  ;;  %5159 = vmatprep.subr.bf16.mxu0 %v5158_v28  ;;  %v5178_v14 = vpack.c.bf16 %v4306_v12, %v4305_v11  ;;  %v4323_v11 = vld [vmem:[%s6689_s5 + $0x62] ss:$0 sm:$0xff] }
 0x58d   :  { %4857 = vmatprep.subr.mxu1 %v5548_v22 }
 0x58e   :  { %4844 = vmatmul.mubr.msk.f32.vlgmr.msra.gmra.mrb[8].mxu1 %vm149_vm2, %v5711_v20 }
 0x58f   :  { %5161 = vmatpush3.bf16.msra.mxu0 %v5158_v28  ;;  %4859 = vmatprep.mubr.msk.f32.mxu1 %vm5549_vm3, %v5548_v22  ;;  %v4271_v28 = vld [vmem:[%s6687_s3 + $0x60] sm:$0xff] }
 0x590   :  { %5171 = vmatprep.subr.bf16.mxu0 %v5170_v31  ;;  %v5190_v30 = vpack.c.bf16 %v4272_v29, %v4271_v28  ;;  %v1652_v28 = vld [vmem:[%s6689_s5 + $0x48] sm:$0xff] }
 0x592   :  { %4833 = vmatmul.mubr.msk.f32.vlgmr.msra.gmra.mrb[8].mxu0 %vm149_vm2, %v5711_v20 }
 0x593   :  { %5173 = vmatpush3.bf16.msra.mxu0 %v5170_v31  ;;  %4854 = vmatprep.mubr.msk.f32.mxu0 %vm149_vm2, %v5699_v15 }
 0x594   :  { %5175 = vmatprep.subr.bf16.mxu0 %v5174_v34 }
 0x597   :  { %5177 = vmatpush3.bf16.msra.mxu0 %v5174_v34 }
 0x598   :  { %4867 = vmatprep.subr.mxu0 %v5548_v22 }
 0x59a   :  { %4855 = vmatmul.mubr.msk.f32.vlgmr.msra.gmra.mrb[10].mxu0 %vm149_vm2, %v5711_v20 }
 0x59b   :  { %4869 = vmatprep.mubr.msk.f32.mxu0 %vm5549_vm3, %v5548_v22 }
 0x659   :  { %v5824_v35 = vpop.f32.mrb[6].mxu1 }
 0x65a   :  { %v4823_v36 = vpop.f32.mrb[7].mxu1 }
 0x65b   :  { %v5196_v36 = vpack.c.bf16 %v4274_v33, %v4273_v32  ;;  %v4324_v33 = vld [vmem:[%s6689_s5 + $0x63] ss:$0 sm:$0xff] }
 0x65d   :  { %v5826_v37 = vpop.f32.mrb[6].mxu0 }
 0x65e   :  { %v4818_v38 = vpop.f32.mrb[7].mxu0 }
 0x661   :  { %v4845_v40 = vpop.f32.mrb[8].mxu1 }
 0x662   :  { %v986_v41 = vpop.f32.mrb[9].mxu1  ;;  %v992_v48 = vadd.f32 %v4845_v40, %v4288_v39  ;;  %v4321_v40 = vld [vmem:[%s6689_s5 + $0x60] ss:$0 sm:$0xff] }
 0x663   :  { %v987_v43 = vadd.f32 %v4288_v39, %v986_v41 }
 0x665   :  { %v4834_v45 = vpop.f32.mrb[8].mxu0  ;;  %4858 = vmatpush3.xpose.msk.msra.mxu1 %vm492_vm4, %v987_v43 }
 0x666   :  { %v898_v46 = vpop.f32.mrb[9].mxu0  ;;  %4862 = vmatprep.subr.mxu1 %v5548_v22  ;;  %v904_v49 = vadd.f32 %v4834_v45, %v4280_v44 }
 0x667   :  { %v899_v47 = vadd.f32 %v4280_v44, %v898_v46 }
 0x669   :  { %4860 = vmatmul.mubr.msk.f32.vlgmr.msra.gmra.mrb[10].mxu1 %vm492_vm4, %v899_v47 }
 0x66a   :  { %4863 = vmatpush3.xpose.msk.msra.mxu1 %vm492_vm4, %v992_v48  ;;  %4864 = vmatprep.mubr.msk.f32.mxu1 %vm5549_vm3, %v5548_v22 }
 0x66b   :  { %4872 = vmatprep.subr.mxu1 %v5548_v22 }
 0x66d   :  { %v4856_v27 = vpop.f32.mrb[10].mxu0  ;;  %4865 = vmatmul.mubr.msk.f32.vlgmr.msra.gmra.mrb[12].mxu1 %vm492_vm4, %v904_v49 }
 0x66e   :  { %v1080_v54 = vadd.f32 %v4856_v27, %v4296_v51  ;;  %v1074_v55 = vpop.f32.mrb[11].mxu0  ;;  %4874 = vmatprep.mubr.msk.f32.mxu1 %vm5549_vm3, %v5548_v22 }
 0x66f   :  { %v1075_v56 = vadd.f32 %v4296_v51, %v1074_v55 }
 0x670   :  { %4873 = vmatpush3.msra.mxu1 %v1080_v54 }
 0x671   :  { %4868 = vmatpush3.msra.mxu0 %v1075_v56 }
 0x672   :  { %5180 = vmatprep.subr.msk.bf16.mxu0 %vm5861_vm6, %v5178_v14 }
 0x73c   :  { %v1155_v57 = vpop.f32.mrb[10].mxu1 }
 0x73d   :  { %v1156_v58 = vadd.f32 %v1155_v57, %v5760_v53  ;;  %v4861_v59 = vpop.f32.mrb[11].mxu1 }
 0x73e   :  { %v1644_v59 = vld [vmem:[%s6689_s5 + $0x8] sm:$0xff] }
 0x73f   :  { %v1235_v60 = vsel %vm645_vm5, %v1156_v58, -inf }
 0x740   :  { %1236 = vmax.xlane.f32.xlu1 %v1235_v60  ;;  %v1231_v61 = vpop.f32.mrb[12].mxu1 }
 0x741   :  { %v1232_v62 = vadd.f32 %v1231_v61, %v5757_v52  ;;  %v4866_v63 = vpop.f32.mrb[13].mxu1  ;;  %v1645_v61 = vld [vmem:[%s6689_s5 + $0x10] sm:$0xff] }
 0x743   :  { %v1238_v0 = vsel %vm645_vm5, %v1232_v62, -inf }
 0x744   :  { %1239 = vmax.xlane.f32.xlu1 %v1238_v0 }
 0x7cd   :  { %v1237_v1 = vpop.xlane.xlu1 %1236 }
 0x7ce   :  { %v1241_v2 = vsub.f32 %v1156_v58, %v1237_v1 }
 0x7d0   :  { %v1243_v3 = vmul.f32 1.442695, %v1241_v2 }
 0x7d1   :  { %v1240_v4 = vpop.xlane.xlu1 %1239 }
 0x7d2   :  { %5472 = vpow2.f32 %v1243_v3  ;;  %v1242_v5 = vsub.f32 %v1232_v62, %v1240_v4  ;;  %v1646_v62 = vld [vmem:[%s6689_s5 + $0x18] sm:$0xff] }
 0x7d3   :  { %v5206_v63 = vpack.c.bf16 %v1646_v62, %v1645_v61 }
 0x7d4   :  { %v1245_v6 = vmul.f32 1.442695, %v1242_v5 }
 0x7d6   :  { %5474 = vpow2.f32 %v1245_v6 }
 0x7dc   :  { %v5473_v7 = vpop.eup %5472 }
 0x7dd   :  { %v1247_v8 = vsel %vm645_vm5, %v5473_v7, 0.0 }
 0x7de   :  { %1248 = vadd.xlane.f32.xlu1 %v1247_v8 }
 0x7e0   :  { %v5475_v9 = vpop.eup %5474 }
 0x7e1   :  { %v1250_v10 = vsel %vm645_vm5, %v5475_v9, 0.0 }
 0x7e2   :  { %1251 = vadd.xlane.f32.xlu0 %v1250_v10 }
 0x86b   :  { %v1249_v16 = vpop.xlane.xlu1 %1248 }
 0x86c   :  { %5476 = vrcp.f32 %v1249_v16 }
 0x86f   :  { %v1252_v17 = vpop.xlane.xlu0 %1251 }
 0x870   :  { %5478 = vrcp.f32 %v1252_v17 }
 0x876   :  { %v5477_v21 = vpop.eup %5476 }
 0x877   :  { %v1255_v23 = vmul.f32 %v5477_v21, %v5473_v7  ;;  %v4322_v7 = vld [vmem:[%s6689_s5 + $0x61] ss:$0 sm:$0xff]  ;;  %v5210_v21 = vpack.c.bf16 %v1648_v19, %v1647_v18  ;;  %v4341_v18 = vld [vmem:[%s6687_s3 + $0x128] sm:$0xff] }
 0x879   :  { %4870 = vmatmul.mubr.msk.f32.vlgmr.msra.gmra.mrb[12].mxu0 %vm645_vm5, %v1255_v23  ;;  %v1649_v23 = vld [vmem:[%s6689_s5 + $0x30] sm:$0xff] }
 0x87a   :  { %v5479_v25 = vpop.eup %5478  ;;  %5183 = vmatpush3.bf16.xpose.msk.msra.mxu0 %vm5861_vm6, %v5178_v14 }
 0x87b   :  { %v1256_v26 = vmul.f32 %v5479_v25, %v5475_v9  ;;  %5186 = vmatprep.subr.msk.bf16.mxu0 %vm5861_vm6, %v5184_v24  ;;  %v1651_v25 = vld [vmem:[%s6689_s5 + $0x40] sm:$0xff] }
 0x87c   :  { %v5218_v29 = vpack.c.bf16 %v1652_v28, %v1651_v25  ;;  %v4342_v25 = vld [vmem:[%s6687_s3 + $0x130] sm:$0xff] }
 0x87d   :  { %4875 = vmatmul.mubr.msk.f32.vlgmr.msra.gmra.mrb[14].mxu1 %vm645_vm5, %v1256_v26 }
 0x882   :  { %5189 = vmatpush3.bf16.xpose.msk.msra.mxu0 %vm5861_vm6, %v5184_v24  ;;  %v1650_v24 = vld [vmem:[%s6689_s5 + $0x38] sm:$0xff] }
 0x883   :  { %5192 = vmatprep.subr.msk.bf16.mxu0 %vm5861_vm6, %v5190_v30  ;;  %v5214_v26 = vpack.c.bf16 %v1650_v24, %v1649_v23  ;;  %v4335_v23 = vld [vmem:[%s6687_s3 + $0x118] sm:$0xff] }
 0x94c   :  { %v1326_v31 = vpop.f32.mrb[12].mxu0 }
 0x94d   :  { %v4871_v34 = vpop.f32.mrb[13].mxu0  ;;  %4885 = vmatprep.mubr.msk.f32.mxu0 %vm492_vm4, %v1326_v31  ;;  %v1654_v31 = vld [vmem:[%s6689_s5 + $0x58] sm:$0xff] }
 0x950   :  { %v1399_v38 = vpop.f32.mrb[14].mxu1 }
 0x951   :  { %v4876_v39 = vpop.f32.mrb[15].mxu1  ;;  %4886 = vmatmul.mubr.msk.f32.vlgmr.msra.gmra.mrb[14].mxu0 %vm492_vm4, %v1399_v38 }
 0x952   :  { %5195 = vmatpush3.bf16.xpose.msk.msra.mxu0 %vm5861_vm6, %v5190_v30  ;;  %4896 = vmatprep.mubr.msk.f32.mxu0 %vm492_vm4, %v5826_v37  ;;  %v1653_v30 = vld [vmem:[%s6689_s5 + $0x50] sm:$0xff] }
 0x953   :  { %5198 = vmatprep.subr.msk.bf16.mxu0 %vm5861_vm6, %v5196_v36  ;;  %v5222_v32 = vpack.c.bf16 %v1654_v31, %v1653_v30  ;;  %v4349_v30 = vld [vmem:[%s6687_s3 + $0x148] sm:$0xff] }
 0x95a   :  { %5201 = vmatpush3.bf16.xpose.msk.msra.mxu0 %vm5861_vm6, %v5196_v36 }
 0x961   :  { %4897 = vmatmul.mubr.msk.f32.vlgmr.msra.gmra.mrb[14].mxu0 %vm492_vm4, %v5824_v35 }
 0xa34   :  { %v4898_v41 = vpop.f32.mrb[14].mxu0 }
 0xa35   :  { %v1600_v43 = vadd.f32 %v4898_v41, %v4321_v40  ;;  %v1585_v44 = vpop.f32.mrb[15].mxu0 }
 0xa36   :  { %v1599_v45 = vadd.f32 %v4321_v40, %v1585_v44 }
 0xa37   :  { %v1602_v46 = vadd.f32 %v1600_v43, %v5711_v20 }
 0xa38   :  { %v1601_v37 = vadd.f32 %v1599_v45, %v5699_v15  ;;  %v1643_v15 = vld [vmem:[%s6689_s5] sm:$0xff] }
 0xa39   :  { %v1608_v47 = vsel %vm149_vm2, %v1602_v46, 0.0  ;;  %v5202_v60 = vpack.c.bf16 %v1644_v59, %v1643_v15 }
 0xa3a   :  { %1609 = vadd.xlane.f32.xlu0 %v1608_v47  ;;  %v1605_v48 = vsel %vm149_vm2, %v1601_v37, 0.0 }
 0xa3b   :  { %1606 = vadd.xlane.f32.xlu1 %v1605_v48  ;;  %5203 = vmatprep.subr.bf16.mxu1 %v5202_v60 }
 0xa3c   :  { %5205 = vmatpush3.bf16.msra.mxu1 %v5202_v60 }
 0xa3d   :  { %5207 = vmatprep.subr.bf16.mxu1 %v5206_v63 }
 0xa40   :  { %5209 = vmatpush3.bf16.msra.mxu1 %v5206_v63 }
 0xa41   :  { %5211 = vmatprep.subr.bf16.mxu1 %v5210_v21 }
 0xac7   :  { %v1610_v49 = vpop.xlane.xlu0 %1609 }
 0xac8   :  { %v1612_v35 = vmul.f32 0.03125, %v1610_v49  ;;  %v1607_v51 = vpop.xlane.xlu1 %1606 }
 0xac9   :  { %v1611_v27 = vmul.f32 0.03125, %v1607_v51 }
 0xaca   :  { %v1614_v54 = vsub.f32 %v1602_v46, %v1612_v35 }
 0xacb   :  { %v1613_v55 = vsub.f32 %v1601_v37, %v1611_v27 }
 0xacc   :  { %v1616_v56 = vmul.f32 %v1614_v54, %v1614_v54 }
 0xacd   :  { %v1615_v57 = vmul.f32 %v1613_v55, %v1613_v55 }
 0xace   :  { %v1620_v58 = vsel %vm149_vm2, %v1616_v56, 0.0 }
 0xacf   :  { %1621 = vadd.xlane.f32.xlu0 %v1620_v58  ;;  %v1617_v20 = vsel %vm149_vm2, %v1615_v57, 0.0 }
 0xad0   :  { %1618 = vadd.xlane.f32.xlu1 %v1617_v20  ;;  %v4327_v20 = vld [vmem:[%s6689_s5 + $0x64] ss:$0 sm:$0xff] }
 0xb5c   :  { %v1622_v0 = vpop.xlane.xlu0 %1621 }
 0xb5d   :  { %v1624_v1 = vmul.f32 0.03125, %v1622_v0  ;;  %v1619_v2 = vpop.xlane.xlu1 %1618 }
 0xb5e   :  { %v1623_v3 = vmul.f32 0.03125, %v1619_v2 }
 0xb5f   :  { %v1626_v4 = vadd.f32 1e-05, %v1624_v1 }
 0xb60   :  { %v1625_v5 = vadd.f32 1e-05, %v1623_v3 }
 0xb61   :  { %5480 = vrsqrt.f32 %v1626_v4 }
 0xb62   :  { %5482 = vrsqrt.f32 %v1625_v5 }
 0xb6b   :  { %v5481_v6 = vpop.eup %5480 }
 0xb6c   :  { %v5483_v8 = vpop.eup %5482  ;;  %v1630_v9 = vmul.f32 %v5481_v6, %v1614_v54 }
 0xb6d   :  { %v1629_v10 = vmul.f32 %v5483_v8, %v1613_v55 }
 0xb6e   :  { %v1636_v12 = vmul.f32 %v4322_v7, %v1630_v9 }
 0xb6f   :  { %v1635_v14 = vmul.f32 %v4322_v7, %v1629_v10 }
 0xb70   :  { %v1642_v17 = vadd.f32 %v4323_v11, %v1636_v12  ;;  %v4332_v12 = vld [vmem:[%s6687_s3 + $0x100] sm:$0xff] }
 0xb71   :  { %v1641_v16 = vadd.f32 %v4323_v11, %v1635_v14  ;;  %v4333_v14 = vld [vmem:[%s6687_s3 + $0x108] sm:$0xff] }
 0xb73   :  { %4907 = vmatprep.mubr.msk.f32.mxu1 %vm149_vm2, %v1641_v16 }
 0xb74   :  { %4908 = vmatmul.mubr.msk.f32.vlgmr.msra.gmra.mrb[16].mxu1 %vm149_vm2, %v1642_v17 }
 0xb75   :  { %5213 = vmatpush3.bf16.msra.mxu1 %v5210_v21  ;;  %v4334_v21 = vld [vmem:[%s6687_s3 + $0x110] sm:$0xff] }
 0xb76   :  { %5215 = vmatprep.subr.bf16.mxu1 %v5214_v26  ;;  %v5230_v24 = vpack.c.bf16 %v4335_v23, %v4334_v21 }
 0xb79   :  { %5217 = vmatpush3.bf16.msra.mxu1 %v5214_v26  ;;  %v4343_v26 = vld [vmem:[%s6687_s3 + $0x138] sm:$0xff] }
 0xb7a   :  { %5219 = vmatprep.subr.bf16.mxu1 %v5218_v29  ;;  %v5238_v28 = vpack.c.bf16 %v4343_v26, %v4342_v25  ;;  %v4374_v25 = vld [vmem:[%s6687_s3 + $0x1a0] sm:$0xff]  ;;  %v4375_v26 = vld [vmem:[%s6687_s3 + $0x1a8] sm:$0xff] }
 0xb7d   :  { %5221 = vmatpush3.bf16.msra.mxu1 %v5218_v29  ;;  %v4348_v29 = vld [vmem:[%s6687_s3 + $0x140] sm:$0xff] }
 0xb7e   :  { %5223 = vmatprep.subr.bf16.mxu1 %v5222_v32  ;;  %v5242_v31 = vpack.c.bf16 %v4349_v30, %v4348_v29  ;;  %v4366_v29 = vld [vmem:[%s6687_s3 + $0x180] sm:$0xff]  ;;  %v4367_v30 = vld [vmem:[%s6687_s3 + $0x188] sm:$0xff] }
 0xb81   :  { %5225 = vmatpush3.bf16.msra.mxu1 %v5222_v32 }
 0xc47   :  { %v4909_v34 = vpop.f32.mrb[16].mxu1 }
 0xc48   :  { %v1738_v36 = vadd.f32 %v4909_v34, %v4324_v33  ;;  %v1732_v38 = vpop.f32.mrb[17].mxu1 }
 0xc49   :  { %v1733_v39 = vadd.f32 %v4324_v33, %v1732_v38 }
 0xc4a   :  { %v1744_v40 = vmul.f32 0.044715, %v1738_v36  ;;  %v1742_v56 = vmul.f32 0.5, %v1738_v36 }
 0xc4b   :  { %v1743_v41 = vmul.f32 0.044715, %v1733_v39  ;;  %v1741_v54 = vmul.f32 0.5, %v1733_v39 }
 0xc4c   :  { %v1746_v43 = vmul.f32 %v1744_v40, %v1738_v36 }
 0xc4d   :  { %v1745_v44 = vmul.f32 %v1743_v41, %v1733_v39  ;;  %v4330_v41 = vld [vmem:[%s6689_s5 + $0x65] ss:$0 sm:$0xff] }
 0xc4e   :  { %v1748_v45 = vmul.f32 %v1746_v43, %v1738_v36 }
 0xc4f   :  { %v1747_v46 = vmul.f32 %v1745_v44, %v1733_v39 }
 0xc50   :  { %v1750_v37 = vadd.f32 %v1748_v45, %v1738_v36 }
 0xc51   :  { %v1749_v47 = vadd.f32 %v1747_v46, %v1733_v39  ;;  %v4331_v46 = vld [vmem:[%s6689_s5 + $0x66] ss:$0 sm:$0xff] }
 0xc52   :  { %v1752_v48 = vmul.f32 0.7978846, %v1750_v37 }
 0xc53   :  { %v1751_v49 = vmul.f32 0.7978846, %v1749_v47 }
 0xc54   :  { %5484 = vtanh.f32 %v1752_v48  ;;  %v4350_v48 = vld [vmem:[%s6687_s3 + $0x150] sm:$0xff] }
 0xc55   :  { %5486 = vtanh.f32 %v1751_v49  ;;  %v4351_v49 = vld [vmem:[%s6687_s3 + $0x158] sm:$0xff] }
 0xc5e   :  { %v5485_v35 = vpop.eup %5484 }
 0xc5f   :  { %v5487_v51 = vpop.eup %5486  ;;  %v1756_v27 = vadd.f32 1.0, %v5485_v35 }
 0xc60   :  { %v1755_v55 = vadd.f32 1.0, %v5487_v51 }
 0xc61   :  { %v1758_v58 = vmul.f32 %v1756_v27, %v1742_v56  ;;  %v5246_v27 = vpack.c.bf16 %v4351_v49, %v4350_v48  ;;  %v4384_v49 = vld [vmem:[%s6687_s3 + $0x1d0] sm:$0xff] }
 0xc62   :  { %v1757_v57 = vmul.f32 %v1755_v55, %v1741_v54  ;;  %v4345_v54 = vld [vmem:[%s6688_s4 + $0x7] ss:$0 sm:$0xff] }
 0xc64   :  { %4926 = vmatprep.mubr.msk.f32.mxu1 %vm1764_vm7, %v1757_v57  ;;  %v4337_v57 = vld [vmem:[%s6688_s4 + $0x6] ss:$0 sm:$0xff] }
 0xc65   :  { %4927 = vmatmul.mubr.msk.f32.vlgmr.msra.gmra.mrb[18].mxu1 %vm1764_vm7, %v1758_v58 }
 0xd38   :  { %v4928_v15 = vpop.f32.mrb[18].mxu1 }
 0xd39   :  { %v1843_v59 = vadd.f32 %v4928_v15, %v4327_v20  ;;  %v1837_v60 = vpop.f32.mrb[19].mxu1 }
 0xd3a   :  { %v1838_v61 = vadd.f32 %v4327_v20, %v1837_v60 }
 0xd3b   :  { %v1847_v62 = vadd.f32 %v1843_v59, %v1642_v17  ;;  %v4340_v17 = vld [vmem:[%s6687_s3 + $0x120] sm:$0xff] }
 0xd3c   :  { %v1846_v63 = vadd.f32 %v1838_v61, %v1641_v16  ;;  %v5226_v16 = vpack.c.bf16 %v4333_v14, %v4332_v12  ;;  %v5234_v19 = vpack.c.bf16 %v4341_v18, %v4340_v17 }
 0xd3d   :  { %v1853_v0 = vsel %vm149_vm2, %v1847_v62, 0.0 }
 0xd3e   :  { %1854 = vadd.xlane.f32.xlu0 %v1853_v0  ;;  %v1850_v1 = vsel %vm149_vm2, %v1846_v63, 0.0  ;;  %5227 = vmatprep.subr.bf16.mxu1 %v5226_v16 }
 0xd3f   :  { %1851 = vadd.xlane.f32.xlu1 %v1850_v1  ;;  %5229 = vmatpush3.bf16.msra.mxu1 %v5226_v16 }
 0xd40   :  { %5235 = vmatprep.subr.bf16.mxu0 %v5234_v19  ;;  %5231 = vmatprep.subr.bf16.mxu1 %v5230_v24 }
 0xd41   :  { %5237 = vmatpush3.bf16.msra.mxu0 %v5234_v19 }
 0xd42   :  { %5239 = vmatprep.subr.bf16.mxu0 %v5238_v28 }
 0xd43   :  { %5233 = vmatpush3.bf16.msra.mxu1 %v5230_v24 }
 0xd44   :  { %5243 = vmatprep.subr.bf16.mxu1 %v5242_v31 }
 0xd45   :  { %5241 = vmatpush3.bf16.msra.mxu0 %v5238_v28  ;;  %v5258_v28 = vpack.c.bf16 %v4375_v26, %v4374_v25 }
 0xd46   :  { %4962 = vmatprep.subr.mxu0 %v5548_v22 }
 0xdcb   :  { %v1855_v2 = vpop.xlane.xlu0 %1854 }
 0xdcc   :  { %v1857_v3 = vmul.f32 0.03125, %v1855_v2  ;;  %v1852_v4 = vpop.xlane.xlu1 %1851 }
 0xdcd   :  { %v1856_v5 = vmul.f32 0.03125, %v1852_v4 }
 0xdce   :  { %v1859_v6 = vsub.f32 %v1847_v62, %v1857_v3  ;;  %v4353_v62 = vld [vmem:[%s6688_s4 + $0x8] ss:$0 sm:$0xff] }
 0xdcf   :  { %v1858_v7 = vsub.f32 %v1846_v63, %v1856_v5 }
 0xdd0   :  { %v1861_v8 = vmul.f32 %v1859_v6, %v1859_v6 }
 0xdd1   :  { %v1860_v9 = vmul.f32 %v1858_v7, %v1858_v7 }
 0xdd2   :  { %v1865_v10 = vsel %vm149_vm2, %v1861_v8, 0.0 }
 0xdd3   :  { %1866 = vadd.xlane.f32.xlu0 %v1865_v10  ;;  %v1862_v11 = vsel %vm149_vm2, %v1860_v9, 0.0 }
 0xdd4   :  { %1863 = vadd.xlane.f32.xlu1 %v1862_v11 }
 0xe60   :  { %v1867_v32 = vpop.xlane.xlu0 %1866 }
 0xe61   :  { %v1869_v33 = vmul.f32 0.03125, %v1867_v32  ;;  %v1864_v34 = vpop.xlane.xlu1 %1863 }
 0xe62   :  { %v1868_v36 = vmul.f32 0.03125, %v1864_v34  ;;  %v4376_v34 = vld [vmem:[%s6687_s3 + $0x1b0] sm:$0xff] }
 0xe63   :  { %v1871_v38 = vadd.f32 1e-05, %v1869_v33 }
 0xe64   :  { %v1870_v39 = vadd.f32 1e-05, %v1868_v36  ;;  %v4377_v36 = vld [vmem:[%s6687_s3 + $0x1b8] sm:$0xff] }
 0xe65   :  { %5488 = vrsqrt.f32 %v1871_v38 }
 0xe66   :  { %5490 = vrsqrt.f32 %v1870_v39  ;;  %v4368_v39 = vld [vmem:[%s6687_s3 + $0x190] sm:$0xff] }
 0xe6f   :  { %v5489_v40 = vpop.eup %5488 }
 0xe70   :  { %v5491_v43 = vpop.eup %5490  ;;  %v1875_v44 = vmul.f32 %v5489_v40, %v1859_v6  ;;  %v4369_v40 = vld [vmem:[%s6687_s3 + $0x198] sm:$0xff] }
 0xe71   :  { %v1874_v45 = vmul.f32 %v5491_v43, %v1858_v7 }
 0xe72   :  { %v1881_v37 = vmul.f32 %v4330_v41, %v1875_v44 }
 0xe73   :  { %v1880_v47 = vmul.f32 %v4330_v41, %v1874_v45  ;;  %v5262_v45 = vpack.c.bf16 %v4377_v36, %v4376_v34  ;;  %v4398_v34 = vld [vmem:[%s6687_s3 + $0x1f0] sm:$0xff]  ;;  %v4399_v36 = vld [vmem:[%s6687_s3 + $0x1f8] sm:$0xff] }
 0xe74   :  { %v6017_v51 = vadd.f32 %v4331_v46, %v1881_v37  ;;  %v4382_v37 = vld [vmem:[%s6687_s3 + $0x1c0] sm:$0xff] }
 0xe75   :  { %v6015_v35 = vadd.f32 %v4331_v46, %v1880_v47  ;;  %v5254_v46 = vpack.c.bf16 %v4369_v40, %v4368_v39  ;;  %v4383_v47 = vld [vmem:[%s6687_s3 + $0x1c8] sm:$0xff]  ;;  %v5280_v40 = vpack.c.bf16 %v4399_v36, %v4398_v34  ;;  %v4424_v34 = vld [vmem:[%s6689_s5 + $0x98] sm:$0xff]  ;;  %v4425_v36 = vld [vmem:[%s6689_s5 + $0xa0] sm:$0xff] }
 0xe76   :  { %v5266_v48 = vpack.c.bf16 %v4383_v47, %v4382_v37  ;;  %v4364_v47 = vld [vmem:[%s6687_s3 + $0x170] sm:$0xff] }
 0xe77   :  { %4937 = vmatprep.mubr.msk.f32.mxu1 %vm149_vm2, %v6015_v35  ;;  %4948 = vmatprep.mubr.msk.f32.mxu0 %vm149_vm2, %v6015_v35 }
 0xe78   :  { %4938 = vmatmul.mubr.msk.f32.vlgmr.msra.gmra.mrb[20].mxu1 %vm149_vm2, %v6017_v51  ;;  %4949 = vmatmul.mubr.msk.f32.vlgmr.msra.gmra.mrb[16].mxu0 %vm149_vm2, %v6017_v51 }
 0xe79   :  { %5245 = vmatpush3.bf16.msra.mxu1 %v5242_v31  ;;  %4959 = vmatprep.mubr.msk.f32.mxu1 %vm149_vm2, %v6015_v35  ;;  %v5250_v31 = vpack.c.bf16 %v4367_v30, %v4366_v29  ;;  %v4397_v30 = vld [vmem:[%s6687_s3 + $0x1e8] sm:$0xff] }
 0xe7a   :  { %5247 = vmatprep.subr.bf16.mxu1 %v5246_v27  ;;  %4964 = vmatprep.mubr.msk.f32.mxu0 %vm5549_vm3, %v5548_v22 }
 0xe7d   :  { %5249 = vmatpush3.bf16.msra.mxu1 %v5246_v27  ;;  %v4385_v27 = vld [vmem:[%s6687_s3 + $0x1d8] sm:$0xff] }
 0xe7e   :  { %4967 = vmatprep.subr.mxu1 %v5548_v22 }
 0xe80   :  { %4960 = vmatmul.mubr.msk.f32.vlgmr.msra.gmra.mrb[22].mxu1 %vm149_vm2, %v6017_v51 }
 0xe81   :  { %4969 = vmatprep.mubr.msk.f32.mxu1 %vm5549_vm3, %v5548_v22 }
 0xf4b   :  { %v4939_v55 = vpop.f32.mrb[20].mxu1  ;;  %v4950_v56 = vpop.f32.mrb[16].mxu0 }
 0xf4c   :  { %v2067_v58 = vadd.f32 %v4950_v56, %v4345_v54  ;;  %v1973_v20 = vpop.f32.mrb[21].mxu1  ;;  %v2061_v15 = vpop.f32.mrb[17].mxu0  ;;  %v1979_v60 = vadd.f32 %v4939_v55, %v4337_v57 }
 0xf4d   :  { %v2062_v59 = vadd.f32 %v4345_v54, %v2061_v15  ;;  %v1974_v61 = vadd.f32 %v4337_v57, %v1973_v20  ;;  %v5270_v54 = vpack.c.bf16 %v4385_v27, %v4384_v49  ;;  %v4379_v20 = vld [vmem:[%s6688_s4 + $0xa] ss:$0 sm:$0xff] }
 0xf4e   :  { %4968 = vmatpush3.xpose.msk.msra.mxu1 %vm492_vm4, %v2067_v58 }
 0xf4f   :  { %4963 = vmatpush3.xpose.msk.msra.mxu0 %vm492_vm4, %v2062_v59  ;;  %4977 = vmatprep.subr.mxu1 %v5548_v22 }
 0xf50   :  { %4972 = vmatprep.subr.mxu0 %v5548_v22 }
 0xf51   :  { %4970 = vmatmul.mubr.msk.f32.vlgmr.msra.gmra.mrb[24].mxu1 %vm492_vm4, %v1979_v60 }
 0xf52   :  { %4965 = vmatmul.mubr.msk.f32.vlgmr.msra.gmra.mrb[18].mxu0 %vm492_vm4, %v1974_v61  ;;  %4979 = vmatprep.mubr.msk.f32.mxu1 %vm5549_vm3, %v5548_v22  ;;  %v4371_v61 = vld [vmem:[%s6688_s4 + $0x9] ss:$0 sm:$0xff] }
 0xf53   :  { %v4961_v63 = vpop.f32.mrb[22].mxu1  ;;  %4974 = vmatprep.mubr.msk.f32.mxu0 %vm5549_vm3, %v5548_v22 }
 0xf54   :  { %v2155_v0 = vadd.f32 %v4961_v63, %v4353_v62  ;;  %v2149_v1 = vpop.f32.mrb[23].mxu1 }
 0xf55   :  { %v2150_v2 = vadd.f32 %v4353_v62, %v2149_v1 }
 0xf56   :  { %4978 = vmatpush3.msra.mxu1 %v2155_v0 }
 0xf57   :  { %4973 = vmatpush3.msra.mxu0 %v2150_v2  ;;  %5259 = vmatprep.subr.bf16.mxu1 %v5258_v28  ;;  %v4387_v2 = vld [vmem:[%s6688_s4 + $0xb] ss:$0 sm:$0xff] }
 0xf58   :  { %5251 = vmatprep.subr.bf16.mxu0 %v5250_v31 }
0x1024   :  { %v2306_v3 = vpop.f32.mrb[24].mxu1 }
0x1025   :  { %v2307_v4 = vadd.f32 %v2306_v3, %v5757_v52  ;;  %v2230_v5 = vpop.f32.mrb[18].mxu0  ;;  %v4971_v6 = vpop.f32.mrb[25].mxu1 }
0x1026   :  { %v2231_v7 = vadd.f32 %v2230_v5, %v5760_v53  ;;  %v4966_v8 = vpop.f32.mrb[19].mxu0 }
0x1027   :  { %v2313_v9 = vsel %vm645_vm5, %v2307_v4, -inf }
0x1028   :  { %2314 = vmax.xlane.f32.xlu1 %v2313_v9  ;;  %v2310_v10 = vsel %vm645_vm5, %v2231_v7, -inf }
0x1029   :  { %2311 = vmax.xlane.f32.xlu0 %v2310_v10 }
0x10b5   :  { %v2315_v11 = vpop.xlane.xlu1 %2314 }
0x10b6   :  { %v2317_v12 = vsub.f32 %v2307_v4, %v2315_v11  ;;  %v2312_v14 = vpop.xlane.xlu0 %2311 }
0x10b7   :  { %v2316_v16 = vsub.f32 %v2231_v7, %v2312_v14 }
0x10b8   :  { %v2320_v17 = vmul.f32 1.442695, %v2317_v12 }
0x10b9   :  { %v2318_v18 = vmul.f32 1.442695, %v2316_v16 }
0x10ba   :  { %5492 = vpow2.f32 %v2320_v17 }
0x10bb   :  { %5494 = vpow2.f32 %v2318_v18 }
0x10c4   :  { %v5493_v19 = vpop.eup %5492 }
0x10c5   :  { %v5495_v21 = vpop.eup %5494  ;;  %v2325_v23 = vsel %vm645_vm5, %v5493_v19, 0.0 }
0x10c6   :  { %2326 = vadd.xlane.f32.xlu1 %v2325_v23  ;;  %v2322_v24 = vsel %vm645_vm5, %v5495_v21, 0.0 }
0x10c7   :  { %2323 = vadd.xlane.f32.xlu0 %v2322_v24 }
0x1153   :  { %v2327_v32 = vpop.xlane.xlu1 %2326 }
0x1154   :  { %5496 = vrcp.f32 %v2327_v32  ;;  %v2324_v33 = vpop.xlane.xlu0 %2323 }
0x1155   :  { %5498 = vrcp.f32 %v2324_v33 }
0x115e   :  { %v5497_v38 = vpop.eup %5496 }
0x115f   :  { %v5499_v41 = vpop.eup %5498  ;;  %v2331_v43 = vmul.f32 %v5497_v38, %v5493_v19 }
0x1160   :  { %v2330_v44 = vmul.f32 %v5499_v41, %v5495_v21 }
0x1161   :  { %4980 = vmatmul.mubr.msk.f32.vlgmr.msra.gmra.mrb[26].mxu1 %vm645_vm5, %v2331_v43 }
0x1162   :  { %5261 = vmatpush3.bf16.msra.mxu1 %v5258_v28  ;;  %4975 = vmatmul.mubr.msk.f32.vlgmr.msra.gmra.mrb[20].mxu0 %vm645_vm5, %v2330_v44  ;;  %v4362_v44 = vld [vmem:[%s6687_s3 + $0x160] sm:$0xff] }
0x1163   :  { %5253 = vmatpush3.bf16.msra.mxu0 %v5250_v31  ;;  %5001 = vmatprep.mubr.msk.f32.mxu1 %vm149_vm2, %v6015_v35 }
0x1164   :  { %4990 = vmatprep.mubr.msk.f32.mxu0 %vm149_vm2, %v6015_v35  ;;  %5263 = vmatprep.subr.bf16.mxu1 %v5262_v45 }
0x1165   :  { %5255 = vmatprep.subr.bf16.mxu0 %v5254_v46 }
0x1166   :  { %5265 = vmatpush3.bf16.msra.mxu1 %v5262_v45  ;;  %v4363_v45 = vld [vmem:[%s6687_s3 + $0x168] sm:$0xff] }
0x1167   :  { %5257 = vmatpush3.bf16.msra.mxu0 %v5254_v46  ;;  %5015 = vmatprep.subr.mxu1 %v5548_v22  ;;  %v5286_v46 = vpack.c.bf16 %v4363_v45, %v4362_v44  ;;  %v4429_v44 = vld [vmem:[%s6689_s5 + $0xc0] sm:$0xff] }
0x1168   :  { %5267 = vmatprep.subr.bf16.mxu0 %v5266_v48 }
0x1169   :  { %5002 = vmatmul.mubr.msk.f32.vlgmr.msra.gmra.mrb[28].mxu1 %vm149_vm2, %v6017_v51 }
0x116a   :  { %4991 = vmatmul.mubr.msk.f32.vlgmr.msra.gmra.mrb[22].mxu0 %vm149_vm2, %v6017_v51  ;;  %5017 = vmatprep.mubr.msk.f32.mxu1 %vm5549_vm3, %v5548_v22 }
0x116b   :  { %5269 = vmatpush3.bf16.msra.mxu0 %v5266_v48  ;;  %5012 = vmatprep.mubr.msk.f32.mxu0 %vm149_vm2, %v6015_v35  ;;  %v4365_v48 = vld [vmem:[%s6687_s3 + $0x178] sm:$0xff] }
0x116c   :  { %5271 = vmatprep.subr.bf16.mxu0 %v5270_v54  ;;  %v5292_v27 = vpack.c.bf16 %v4365_v48, %v4364_v47 }
0x116f   :  { %5273 = vmatpush3.bf16.msra.mxu0 %v5270_v54 }
0x1170   :  { %5025 = vmatprep.subr.mxu0 %v5548_v22 }
0x1172   :  { %5013 = vmatmul.mubr.msk.f32.vlgmr.msra.gmra.mrb[24].mxu0 %vm149_vm2, %v6017_v51 }
0x1173   :  { %5027 = vmatprep.mubr.msk.f32.mxu0 %vm5549_vm3, %v5548_v22 }
0x1234   :  { %v6117_v55 = vpop.f32.mrb[26].mxu1 }
0x1235   :  { %v6119_v56 = vpop.f32.mrb[20].mxu0  ;;  %v4981_v57 = vpop.f32.mrb[27].mxu1 }
0x1236   :  { %v4976_v58 = vpop.f32.mrb[21].mxu0 }
0x1237   :  { %v4413_v58 = vld [vmem:[%s6689_s5 + $0xc8] ss:$0 sm:$0xff] }
0x123c   :  { %v5003_v15 = vpop.f32.mrb[28].mxu1 }
0x123d   :  { %v4992_v59 = vpop.f32.mrb[22].mxu0  ;;  %v2650_v60 = vpop.f32.mrb[29].mxu1  ;;  %v2656_v1 = vadd.f32 %v5003_v15, %v4379_v20 }
0x123e   :  { %v2651_v62 = vadd.f32 %v4379_v20, %v2650_v60  ;;  %v2562_v63 = vpop.f32.mrb[23].mxu0  ;;  %v2568_v3 = vadd.f32 %v4992_v59, %v4371_v61 }
0x123f   :  { %v2563_v0 = vadd.f32 %v4371_v61, %v2562_v63 }
0x1240   :  { %5016 = vmatpush3.xpose.msk.msra.mxu1 %vm492_vm4, %v2651_v62 }
0x1241   :  { %5020 = vmatprep.subr.mxu1 %v5548_v22 }
0x1243   :  { %5018 = vmatmul.mubr.msk.f32.vlgmr.msra.gmra.mrb[30].mxu1 %vm492_vm4, %v2563_v0 }
0x1244   :  { %5021 = vmatpush3.xpose.msk.msra.mxu1 %vm492_vm4, %v2656_v1  ;;  %5022 = vmatprep.mubr.msk.f32.mxu1 %vm5549_vm3, %v5548_v22 }
0x1245   :  { %v5014_v4 = vpop.f32.mrb[24].mxu0  ;;  %5030 = vmatprep.subr.mxu1 %v5548_v22 }
0x1246   :  { %v2744_v5 = vadd.f32 %v5014_v4, %v4387_v2  ;;  %v2738_v6 = vpop.f32.mrb[25].mxu0 }
0x1247   :  { %v2739_v7 = vadd.f32 %v4387_v2, %v2738_v6  ;;  %5023 = vmatmul.mubr.msk.f32.vlgmr.msra.gmra.mrb[32].mxu1 %vm492_vm4, %v2568_v3 }
0x1248   :  { %5031 = vmatpush3.msra.mxu1 %v2744_v5  ;;  %5032 = vmatprep.mubr.msk.f32.mxu1 %vm5549_vm3, %v5548_v22 }
0x1249   :  { %5026 = vmatpush3.msra.mxu0 %v2739_v7  ;;  %v4419_v7 = vld [vmem:[%s6689_s5 + $0x70] sm:$0xff] }
0x1316   :  { %v2819_v8 = vpop.f32.mrb[30].mxu1 }
0x1317   :  { %v2820_v9 = vadd.f32 %v2819_v8, %v5760_v53  ;;  %v5019_v10 = vpop.f32.mrb[31].mxu1 }
0x1318   :  { %v4421_v10 = vld [vmem:[%s6689_s5 + $0x80] sm:$0xff] }
0x1319   :  { %v2899_v11 = vsel %vm645_vm5, %v2820_v9, -inf }
0x131a   :  { %2900 = vmax.xlane.f32.xlu1 %v2899_v11  ;;  %v2895_v12 = vpop.f32.mrb[32].mxu1 }
0x131b   :  { %v2896_v14 = vadd.f32 %v2895_v12, %v5757_v52  ;;  %v5024_v16 = vpop.f32.mrb[33].mxu1  ;;  %v4396_v52 = vld [vmem:[%s6687_s3 + $0x1e0] sm:$0xff] }
0x131c   :  { %v5274_v31 = vpack.c.bf16 %v4397_v30, %v4396_v52 }
0x131d   :  { %v2902_v17 = vsel %vm645_vm5, %v2896_v14, -inf }
0x131e   :  { %2903 = vmax.xlane.f32.xlu0 %v2902_v17  ;;  %5276 = vmatprep.subr.msk.bf16.mxu0 %vm5861_vm6, %v5274_v31 }
0x13a7   :  { %v2901_v18 = vpop.xlane.xlu1 %2900 }
0x13a8   :  { %v2905_v19 = vsub.f32 %v2820_v9, %v2901_v18  ;;  %v4420_v9 = vld [vmem:[%s6689_s5 + $0x78] sm:$0xff] }
0x13a9   :  { %v5302_v11 = vpack.c.bf16 %v4421_v10, %v4420_v9 }
0x13aa   :  { %v2907_v21 = vmul.f32 1.442695, %v2905_v19 }
0x13ab   :  { %v2904_v23 = vpop.xlane.xlu0 %2903 }
0x13ac   :  { %5500 = vpow2.f32 %v2907_v21  ;;  %v2906_v24 = vsub.f32 %v2896_v14, %v2904_v23  ;;  %v4416_v23 = vld [vmem:[%s6689_s5 + $0xc9] ss:$0 sm:$0xff] }
0x13ae   :  { %v2909_v25 = vmul.f32 1.442695, %v2906_v24 }
0x13b0   :  { %5502 = vpow2.f32 %v2909_v25 }
0x13b6   :  { %v5501_v53 = vpop.eup %5500 }
0x13b7   :  { %v2911_v26 = vsel %vm645_vm5, %v5501_v53, 0.0 }
0x13b8   :  { %2912 = vadd.xlane.f32.xlu1 %v2911_v26  ;;  %v4417_v26 = vld [vmem:[%s6689_s5 + $0xca] ss:$0 sm:$0xff] }
0x13ba   :  { %v5503_v28 = vpop.eup %5502 }
0x13bb   :  { %v2914_v29 = vsel %vm645_vm5, %v5503_v28, 0.0 }
0x13bc   :  { %2915 = vadd.xlane.f32.xlu0 %v2914_v29 }
0x1445   :  { %v2913_v32 = vpop.xlane.xlu1 %2912 }
0x1446   :  { %5504 = vrcp.f32 %v2913_v32  ;;  %v4423_v32 = vld [vmem:[%s6689_s5 + $0x90] sm:$0xff] }
0x1449   :  { %v2916_v33 = vpop.xlane.xlu0 %2915 }
0x144a   :  { %5506 = vrcp.f32 %v2916_v33 }
0x1450   :  { %v5505_v38 = vpop.eup %5504 }
0x1451   :  { %v2919_v39 = vmul.f32 %v5505_v38, %v5501_v53  ;;  %v4426_v38 = vld [vmem:[%s6689_s5 + $0xa8] sm:$0xff] }
0x1453   :  { %5028 = vmatmul.mubr.msk.f32.vlgmr.msra.gmra.mrb[26].mxu0 %vm645_vm5, %v2919_v39  ;;  %v5310_v39 = vpack.c.bf16 %v4425_v36, %v4424_v34 }
0x1454   :  { %v5507_v41 = vpop.eup %5506  ;;  %5279 = vmatpush3.bf16.xpose.msk.msra.mxu0 %vm5861_vm6, %v5274_v31  ;;  %v4422_v31 = vld [vmem:[%s6689_s5 + $0x88] sm:$0xff] }
0x1455   :  { %v2920_v43 = vmul.f32 %v5507_v41, %v5503_v28  ;;  %5282 = vmatprep.subr.msk.bf16.mxu0 %vm5861_vm6, %v5280_v40  ;;  %v5306_v33 = vpack.c.bf16 %v4423_v32, %v4422_v31 }
0x1457   :  { %5033 = vmatmul.mubr.msk.f32.vlgmr.msra.gmra.mrb[34].mxu1 %vm645_vm5, %v2920_v43  ;;  %v4428_v43 = vld [vmem:[%s6689_s5 + $0xb8] sm:$0xff] }
0x1458   :  { %v5318_v45 = vpack.c.bf16 %v4429_v44, %v4428_v43 }
0x145c   :  { %5285 = vmatpush3.bf16.xpose.msk.msra.mxu0 %vm5861_vm6, %v5280_v40  ;;  %v4427_v40 = vld [vmem:[%s6689_s5 + $0xb0] sm:$0xff] }
0x145d   :  { %5288 = vmatprep.subr.msk.bf16.mxu0 %vm5861_vm6, %v5286_v46  ;;  %v5314_v41 = vpack.c.bf16 %v4427_v40, %v4426_v38  ;;  %v4440_v40 = vld [vmem:[%s6689_s5 + $0xcd] ss:$0 sm:$0xff] }
0x1526   :  { %v2990_v37 = vpop.f32.mrb[26].mxu0 }
0x1527   :  { %v5029_v49 = vpop.f32.mrb[27].mxu0  ;;  %5043 = vmatprep.mubr.msk.f32.mxu0 %vm492_vm4, %v2990_v37 }
0x152a   :  { %v3063_v54 = vpop.f32.mrb[34].mxu1 }
0x152b   :  { %v5034_v57 = vpop.f32.mrb[35].mxu1  ;;  %5044 = vmatmul.mubr.msk.f32.vlgmr.msra.gmra.mrb[28].mxu0 %vm492_vm4, %v3063_v54 }
0x152c   :  { %5291 = vmatpush3.bf16.xpose.msk.msra.mxu0 %vm5861_vm6, %v5286_v46  ;;  %5054 = vmatprep.mubr.msk.f32.mxu0 %vm492_vm4, %v6119_v56  ;;  %v4431_v46 = vld [vmem:[%s6689_s5 + $0xcb] ss:$0 sm:$0xff] }
0x152d   :  { %5294 = vmatprep.subr.msk.bf16.mxu0 %vm5861_vm6, %v5292_v27 }
0x1534   :  { %5297 = vmatpush3.bf16.xpose.msk.msra.mxu0 %vm5861_vm6, %v5292_v27 }
0x153b   :  { %5055 = vmatmul.mubr.msk.f32.vlgmr.msra.gmra.mrb[28].mxu0 %vm492_vm4, %v6117_v55 }
0x153c   :  { %3761 = vmatprep.mubr.f32.mxu0 %v5548_v22 }
0x160e   :  { %v5056_v20 = vpop.f32.mrb[28].mxu0 }
0x160f   :  { %v3265_v15 = vadd.f32 %v5056_v20, %v4413_v58  ;;  %v3249_v59 = vpop.f32.mrb[29].mxu0 }
0x1610   :  { %v3264_v60 = vadd.f32 %v4413_v58, %v3249_v59 }
0x1611   :  { %v3267_v56 = vadd.f32 %v3265_v15, %v6017_v51 }
0x1612   :  { %v3266_v61 = vadd.f32 %v3264_v60, %v6015_v35  ;;  %v4418_v35 = vld [vmem:[%s6689_s5 + $0x68] sm:$0xff] }
0x1613   :  { %v3273_v13 = vsel %vm149_vm2, %v3267_v56, 0.0  ;;  %v5298_v8 = vpack.c.bf16 %v4419_v7, %v4418_v35 }
0x1614   :  { %3274 = vadd.xlane.f32.xlu0 %v3273_v13  ;;  %v3270_v62 = vsel %vm149_vm2, %v3266_v61, 0.0 }
0x1615   :  { %3271 = vadd.xlane.f32.xlu1 %v3270_v62  ;;  %5299 = vmatprep.subr.bf16.mxu1 %v5298_v8 }
0x1616   :  { %5301 = vmatpush3.bf16.msra.mxu1 %v5298_v8 }
0x1617   :  { %5303 = vmatprep.subr.bf16.mxu1 %v5302_v11 }
0x161a   :  { %5305 = vmatpush3.bf16.msra.mxu1 %v5302_v11 }
0x161b   :  { %5307 = vmatprep.subr.bf16.mxu1 %v5306_v33 }
0x16a1   :  { %v3275_v55 = vpop.xlane.xlu0 %3274 }
0x16a2   :  { %v3277_v63 = vmul.f32 0.03125, %v3275_v55  ;;  %v3272_v0 = vpop.xlane.xlu1 %3271 }
0x16a3   :  { %v3276_v1 = vmul.f32 0.03125, %v3272_v0 }
0x16a4   :  { %v3279_v2 = vsub.f32 %v3267_v56, %v3277_v63 }
0x16a5   :  { %v3278_v3 = vsub.f32 %v3266_v61, %v3276_v1 }
0x16a6   :  { %v3281_v4 = vmul.f32 %v3279_v2, %v3279_v2 }
0x16a7   :  { %v3280_v5 = vmul.f32 %v3278_v3, %v3278_v3 }
0x16a8   :  { %v3285_v6 = vsel %vm149_vm2, %v3281_v4, 0.0  ;;  %v4435_v4 = vld [vmem:[%s6689_s5 + $0xcc] ss:$0 sm:$0xff] }
0x16a9   :  { %3286 = vadd.xlane.f32.xlu0 %v3285_v6  ;;  %v3282_v51 = vsel %vm149_vm2, %v3280_v5, 0.0 }
0x16aa   :  { %3283 = vadd.xlane.f32.xlu1 %v3282_v51 }
0x1736   :  { %v3287_v12 = vpop.xlane.xlu0 %3286 }
0x1737   :  { %v3289_v14 = vmul.f32 0.03125, %v3287_v12  ;;  %v3284_v16 = vpop.xlane.xlu1 %3283 }
0x1738   :  { %v3288_v17 = vmul.f32 0.03125, %v3284_v16 }
0x1739   :  { %v3291_v18 = vadd.f32 1e-05, %v3289_v14 }
0x173a   :  { %v3290_v19 = vadd.f32 1e-05, %v3288_v17 }
0x173b   :  { %5508 = vrsqrt.f32 %v3291_v18 }
0x173c   :  { %5510 = vrsqrt.f32 %v3290_v19 }
0x1745   :  { %v5509_v21 = vpop.eup %5508 }
0x1746   :  { %v5511_v24 = vpop.eup %5510  ;;  %v3295_v25 = vmul.f32 %v5509_v21, %v3279_v2 }
0x1747   :  { %v3294_v53 = vmul.f32 %v5511_v24, %v3278_v3 }
0x1748   :  { %v3301_v28 = vmul.f32 %v4416_v23, %v3295_v25  ;;  %v3552_v25 = vld [vmem:[%s6690_s6 + $0x30] sm:$0xff] }
0x1749   :  { %v3300_v29 = vmul.f32 %v4416_v23, %v3294_v53  ;;  %v3553_v53 = vld [vmem:[%s6690_s6 + $0x68] sm:$0xff] }
0x174a   :  { %v3307_v30 = vadd.f32 %v4417_v26, %v3301_v28  ;;  %v5551_v28 = vmov 0.0|0.0  }
0x174b   :  { %v3306_v52 = vadd.f32 %v4417_v26, %v3300_v29  ;;  %v5323_v26 = vpack.c.bf16 %v3553_v53, %v3552_v25  ;;  %v3554_v29 = vld [vmem:[%s6690_s6 + $0xa0] sm:$0xff]  ;;  %v3652_v25 = vld [vmem:[%s6690_s6 + $0x98] sm:$0xff]  ;;  %v3658_v53 = vld [vmem:[%s6690_s6 + $0xd0] sm:$0xff] }
0x174d   :  { %5065 = vmatprep.mubr.msk.f32.mxu1 %vm149_vm2, %v3306_v52 }
0x174e   :  { %5066 = vmatmul.mubr.msk.f32.vlgmr.msra.gmra.mrb[36].mxu1 %vm149_vm2, %v3307_v30 }
0x174f   :  { %5309 = vmatpush3.bf16.msra.mxu1 %v5306_v33 }
0x1750   :  { %5311 = vmatprep.subr.bf16.mxu1 %v5310_v39 }
0x1753   :  { %5313 = vmatpush3.bf16.msra.mxu1 %v5310_v39 }
0x1754   :  { %5315 = vmatprep.subr.bf16.mxu1 %v5314_v41 }
0x1757   :  { %5317 = vmatpush3.bf16.msra.mxu1 %v5314_v41 }
0x1758   :  { %5319 = vmatprep.subr.bf16.mxu1 %v5318_v45 }
0x175b   :  { %5321 = vmatpush3.bf16.msra.mxu1 %v5318_v45  ;;  %v4441_v45 = vld [vmem:[%s6689_s5 + $0xce] ss:$0 sm:$0xff] }
0x175c   :  { %5322 = vmatprep.subr.bf16.mxu1 %v5551_v28 }
0x1821   :  { %v5067_v37 = vpop.f32.mrb[36].mxu1 }
0x1822   :  { %v3403_v47 = vadd.f32 %v5067_v37, %v4431_v46  ;;  %v3397_v48 = vpop.f32.mrb[37].mxu1 }
0x1823   :  { %v3398_v49 = vadd.f32 %v4431_v46, %v3397_v48 }
0x1824   :  { %v3409_v27 = vmul.f32 0.044715, %v3403_v47  ;;  %v3407_v1 = vmul.f32 0.5, %v3403_v47 }
0x1825   :  { %v3408_v54 = vmul.f32 0.044715, %v3398_v49  ;;  %v3406_v63 = vmul.f32 0.5, %v3398_v49 }
0x1826   :  { %v3411_v57 = vmul.f32 %v3409_v27, %v3403_v47 }
0x1827   :  { %v3410_v58 = vmul.f32 %v3408_v54, %v3398_v49  ;;  %v3636_v54 = vld [vmem:[%s6690_s6 + $0x8] sm:$0xff] }
0x1828   :  { %v3413_v20 = vmul.f32 %v3411_v57, %v3403_v47  ;;  %v3642_v57 = vld [vmem:[%s6690_s6 + $0x40] sm:$0xff] }
0x1829   :  { %v3412_v15 = vmul.f32 %v3410_v58, %v3398_v49  ;;  %v5328_v58 = vpack.c.bf16 %v3642_v57, %v3636_v54  ;;  %v3921_v57 = vld [vmem:[%s6691_s7 + $0x20] sm:$0xff] }
0x182a   :  { %v3415_v59 = vadd.f32 %v3413_v20, %v3403_v47  ;;  %v3635_v20 = vld [vmem:[%s6690_s6] sm:$0xff] }
0x182b   :  { %v3414_v60 = vadd.f32 %v3412_v15, %v3398_v49  ;;  %v3641_v15 = vld [vmem:[%s6690_s6 + $0x38] sm:$0xff]  ;;  %5329 = vmatprep.subr.bf16.mxu0 %v5328_v58  ;;  %v3922_v58 = vld [vmem:[%s6691_s7 + $0x28] sm:$0xff] }
0x182c   :  { %v3417_v56 = vmul.f32 0.7978846, %v3415_v59  ;;  %v3638_v59 = vld [vmem:[%s6690_s6 + $0x18] sm:$0xff] }
0x182d   :  { %v3416_v61 = vmul.f32 0.7978846, %v3414_v60  ;;  %v5330_v60 = vpack.c.bf16 %v3641_v15, %v3635_v20  ;;  %v3939_v20 = vld [vmem:[%s6691_s7 + $0xb0] sm:$0xff]  ;;  %v3940_v15 = vld [vmem:[%s6691_s7 + $0xb8] sm:$0xff] }
0x182e   :  { %5512 = vtanh.f32 %v3417_v56  ;;  %v3644_v56 = vld [vmem:[%s6690_s6 + $0x50] sm:$0xff] }
0x182f   :  { %5514 = vtanh.f32 %v3416_v61  ;;  %v3637_v61 = vld [vmem:[%s6690_s6 + $0x10] sm:$0xff]  ;;  %5331 = vmatpush1.bf16.msra.mxu0 %v5330_v60 }
0x1838   :  { %v5513_v13 = vpop.eup %5512 }
0x1839   :  { %v5515_v62 = vpop.eup %5514  ;;  %v3421_v55 = vadd.f32 1.0, %v5513_v13  ;;  %v3643_v13 = vld [vmem:[%s6690_s6 + $0x48] sm:$0xff] }
0x183a   :  { %v3420_v0 = vadd.f32 1.0, %v5515_v62  ;;  %v5336_v62 = vpack.c.bf16 %v3644_v56, %v3638_v59  ;;  %v3951_v56 = vld [vmem:[%s6691_s7 + $0x110] sm:$0xff] }
0x183b   :  { %v3423_v3 = vmul.f32 %v3421_v55, %v3407_v1  ;;  %v5338_v55 = vpack.c.bf16 %v3643_v13, %v3637_v61  ;;  %v3647_v1 = vld [vmem:[%s6690_s6 + $0x70] sm:$0xff]  ;;  %v3952_v61 = vld [vmem:[%s6691_s7 + $0x118] sm:$0xff]  ;;  %v5362_v13 = vpack.c.bf16 %v3922_v58, %v3921_v57 }
0x183c   :  { %v3422_v2 = vmul.f32 %v3420_v0, %v3406_v63  ;;  %v3648_v63 = vld [vmem:[%s6690_s6 + $0x78] sm:$0xff]  ;;  %v3654_v0 = vld [vmem:[%s6690_s6 + $0xb0] sm:$0xff] }
0x183d   :  { %v3947_v57 = vld [vmem:[%s6691_s7 + $0xf0] sm:$0xff]  ;;  %v3948_v58 = vld [vmem:[%s6691_s7 + $0xf8] sm:$0xff] }
0x183e   :  { %5084 = vmatprep.mubr.msk.f32.mxu1 %vm1764_vm7, %v3422_v2  ;;  %v5332_v2 = vpack.c.bf16 %v3654_v0, %v3648_v63  ;;  %v5364_v63 = vpack.c.bf16 %v3940_v15, %v3939_v20  ;;  %v3923_v0 = vld [vmem:[%s6691_s7 + $0x30] sm:$0xff]  ;;  %v5380_v20 = vpack.c.bf16 %v3948_v58, %v3947_v57  ;;  %v4005_v57 = vld [vmem:[%s6691_s7 + $0x2c0] sm:$0xff]  ;;  %v4006_v58 = vld [vmem:[%s6691_s7 + $0x2c8] sm:$0xff] }
0x183f   :  { %5085 = vmatmul.mubr.msk.f32.vlgmr.msra.gmra.mrb[38].mxu1 %vm1764_vm7, %v3423_v3  ;;  %v3653_v3 = vld [vmem:[%s6690_s6 + $0xa8] sm:$0xff]  ;;  %v3931_v15 = vld [vmem:[%s6691_s7 + $0x70] sm:$0xff] }
0x1840   :  { %5095 = vmatprep.mubr.msk.f32.mxu1 %vm5549_vm3, %v5548_v22  ;;  %5324 = vmatpush3.bf16.msra.mxu1 %v5323_v26  ;;  %v3917_v26 = vld [vmem:[%s6691_s7] sm:$0xff] }
0x1841   :  { %5325 = vmatprep.subr.bf16.mxu1 %v5551_v28  ;;  %5333 = vmatprep.subr.bf16.mxu0 %v5332_v2  ;;  %v3918_v28 = vld [vmem:[%s6691_s7 + $0x8] sm:$0xff]  ;;  %v3941_v2 = vld [vmem:[%s6691_s7 + $0xc0] sm:$0xff] }
0x1912   :  { %v5086_v5 = vpop.f32.mrb[38].mxu1 }
0x1913   :  { %v3507_v6 = vadd.f32 %v5086_v5, %v4435_v4  ;;  %v3501_v51 = vpop.f32.mrb[39].mxu1  ;;  %v3656_v5 = vld [vmem:[%s6690_s6 + $0xc0] sm:$0xff] }
0x1914   :  { %v3502_v35 = vadd.f32 %v4435_v4, %v3501_v51  ;;  %v3650_v4 = vld [vmem:[%s6690_s6 + $0x88] sm:$0xff] }
0x1915   :  { %v3511_v7 = vadd.f32 %v3507_v6, %v3307_v30  ;;  %v5334_v6 = vpack.c.bf16 %v3653_v3, %v3647_v1  ;;  %v5340_v51 = vpack.c.bf16 %v3656_v5, %v3650_v4  ;;  %v3924_v1 = vld [vmem:[%s6691_s7 + $0x38] sm:$0xff]  ;;  %v3942_v3 = vld [vmem:[%s6691_s7 + $0xc8] sm:$0xff]  ;;  %v5390_v4 = vpack.c.bf16 %v3952_v61, %v3951_v56 }
0x1916   :  { %v3510_v8 = vadd.f32 %v3502_v35, %v3306_v52  ;;  %v3555_v52 = vld [vmem:[%s6690_s6 + $0xd8] sm:$0xff]  ;;  %v3649_v35 = vld [vmem:[%s6690_s6 + $0x80] sm:$0xff] }
0x1917   :  { %v3517_v9 = vsel %vm149_vm2, %v3511_v7, 0.0  ;;  %v5326_v30 = vpack.c.bf16 %v3555_v52, %v3554_v29  ;;  %5335 = vmatpush1.bf16.msra.mxu0 %v5334_v6  ;;  %v3935_v29 = vld [vmem:[%s6691_s7 + $0x90] sm:$0xff]  ;;  %v3936_v52 = vld [vmem:[%s6691_s7 + $0x98] sm:$0xff]  ;;  %v3953_v6 = vld [vmem:[%s6691_s7 + $0x120] sm:$0xff] }
0x1918   :  { %3518 = vadd.xlane.f32.xlu1 %v3517_v9  ;;  %v3514_v10 = vsel %vm149_vm2, %v3510_v8, 0.0  ;;  %v3980_v61 = vld [vmem:[%s6691_s7 + $0x1f8] sm:$0xff] }
0x1919   :  { %3515 = vadd.xlane.f32.xlu0 %v3514_v10  ;;  %5327 = vmatpush3.bf16.msra.mxu1 %v5326_v30  ;;  %v3646_v10 = vld [vmem:[%s6690_s6 + $0x60] sm:$0xff] }
0x191a   :  { %5337 = vmatprep.subr.bf16.mxu1 %v5336_v62  ;;  %v3969_v62 = vld [vmem:[%s6691_s7 + $0x1a0] sm:$0xff] }
0x19a5   :  { %v3519_v11 = vpop.xlane.xlu1 %3518 }
0x19a6   :  { %v3521_v12 = vmul.f32 0.03125, %v3519_v11  ;;  %v3516_v14 = vpop.xlane.xlu0 %3515 }
0x19a7   :  { %v3520_v16 = vmul.f32 0.03125, %v3516_v14  ;;  %v3934_v14 = vld [vmem:[%s6691_s7 + $0x88] sm:$0xff] }
0x19a8   :  { %v3523_v17 = vsub.f32 %v3511_v7, %v3521_v12  ;;  %v3655_v7 = vld [vmem:[%s6690_s6 + $0xb8] sm:$0xff]  ;;  %v3933_v12 = vld [vmem:[%s6691_s7 + $0x80] sm:$0xff] }
0x19a9   :  { %v3522_v18 = vsub.f32 %v3510_v8, %v3520_v16  ;;  %v3640_v8 = vld [vmem:[%s6690_s6 + $0x28] sm:$0xff]  ;;  %v5342_v9 = vpack.c.bf16 %v3655_v7, %v3649_v35  ;;  %v5352_v16 = vpack.c.bf16 %v3934_v14, %v3933_v12  ;;  %v5366_v35 = vpack.c.bf16 %v3924_v1, %v3923_v0  ;;  %v3971_v7 = vld [vmem:[%s6691_s7 + $0x1b0] sm:$0xff]  ;;  %v3944_v14 = vld [vmem:[%s6691_s7 + $0xd8] sm:$0xff] }
0x19aa   :  { %v3525_v19 = vmul.f32 %v3523_v17, %v3523_v17  ;;  %v5344_v11 = vpack.c.bf16 %v3646_v10, %v3640_v8  ;;  %v3972_v8 = vld [vmem:[%s6691_s7 + $0x1b8] sm:$0xff]  ;;  %v3925_v10 = vld [vmem:[%s6691_s7 + $0x40] sm:$0xff]  ;;  %v3943_v12 = vld [vmem:[%s6691_s7 + $0xd0] sm:$0xff] }
0x19ab   :  { %v3524_v21 = vmul.f32 %v3522_v18, %v3522_v18  ;;  %v3997_v0 = vld [vmem:[%s6691_s7 + $0x280] sm:$0xff]  ;;  %v3998_v1 = vld [vmem:[%s6691_s7 + $0x288] sm:$0xff] }
0x19ac   :  { %v3529_v23 = vsel %vm149_vm2, %v3525_v19, 0.0  ;;  %5345 = vmatprep.subr.bf16.mxu0 %v5344_v11  ;;  %v3926_v11 = vld [vmem:[%s6691_s7 + $0x48] sm:$0xff] }
0x19ad   :  { %3530 = vadd.xlane.f32.xlu1 %v3529_v23  ;;  %v3526_v24 = vsel %vm149_vm2, %v3524_v21, 0.0  ;;  %v3639_v23 = vld [vmem:[%s6690_s6 + $0x20] sm:$0xff] }
0x19ae   :  { %3527 = vadd.xlane.f32.xlu0 %v3526_v24  ;;  %v3645_v24 = vld [vmem:[%s6690_s6 + $0x58] sm:$0xff] }
0x19af   :  { %v5346_v30 = vpack.c.bf16 %v3645_v24, %v3639_v23  ;;  %v3973_v23 = vld [vmem:[%s6691_s7 + $0x1c0] sm:$0xff]  ;;  %v3974_v24 = vld [vmem:[%s6691_s7 + $0x1c8] sm:$0xff] }
0x1a3a   :  { %v3531_v31 = vpop.xlane.xlu1 %3530 }
0x1a3b   :  { %v3533_v32 = vmul.f32 0.03125, %v3531_v31  ;;  %v3528_v33 = vpop.xlane.xlu0 %3527  ;;  %v5348_v31 = vpack.c.bf16 %v3658_v53, %v3652_v25  ;;  %v5372_v25 = vpack.c.bf16 %v3944_v14, %v3943_v12  ;;  %v3927_v53 = vld [vmem:[%s6691_s7 + $0x50] sm:$0xff] }
0x1a3c   :  { %v3532_v34 = vmul.f32 0.03125, %v3528_v33  ;;  %v3657_v33 = vld [vmem:[%s6690_s6 + $0xc8] sm:$0xff] }
0x1a3d   :  { %v3535_v36 = vadd.f32 1e-05, %v3533_v32  ;;  %v3651_v32 = vld [vmem:[%s6690_s6 + $0x90] sm:$0xff] }
0x1a3e   :  { %v3534_v38 = vadd.f32 1e-05, %v3532_v34  ;;  %v5354_v34 = vpack.c.bf16 %v3918_v28, %v3917_v26  ;;  %v3928_v26 = vld [vmem:[%s6691_s7 + $0x58] sm:$0xff]  ;;  %v3945_v28 = vld [vmem:[%s6691_s7 + $0xe0] sm:$0xff] }
0x1a3f   :  { %5516 = vrsqrt.f32 %v3535_v36  ;;  %v3965_v36 = vld [vmem:[%s6691_s7 + $0x180] sm:$0xff] }
0x1a40   :  { %5518 = vrsqrt.f32 %v3534_v38 }
0x1a49   :  { %v5517_v39 = vpop.eup %5516 }
0x1a4a   :  { %v5519_v41 = vpop.eup %5518  ;;  %v3539_v43 = vmul.f32 %v5517_v39, %v3523_v17  ;;  %v3556_v17 = vld [vmem:[%s6690_s6 + $0xe1] ss:$0 sm:$0xff]  ;;  %v3966_v39 = vld [vmem:[%s6691_s7 + $0x188] sm:$0xff] }
0x1a4b   :  { %v3538_v44 = vmul.f32 %v5519_v41, %v3522_v18  ;;  %v3919_v41 = vld [vmem:[%s6691_s7 + $0x10] sm:$0xff] }
0x1a4c   :  { %v3545_v46 = vmul.f32 %v4440_v40, %v3539_v43  ;;  %v3920_v43 = vld [vmem:[%s6691_s7 + $0x18] sm:$0xff] }
0x1a4d   :  { %v3544_v37 = vmul.f32 %v4440_v40, %v3538_v44  ;;  %v5356_v40 = vpack.c.bf16 %v3936_v52, %v3935_v29  ;;  %v3937_v44 = vld [vmem:[%s6691_s7 + $0xa0] sm:$0xff]  ;;  %v3946_v29 = vld [vmem:[%s6691_s7 + $0xe8] sm:$0xff] }
0x1a4e   :  { %v3551_v47 = vadd.f32 %v4441_v45, %v3545_v46  ;;  %v5350_v46 = vpack.c.bf16 %v3657_v33, %v3651_v32  ;;  %v3958_v32 = vld [vmem:[%s6691_s7 + $0x148] sm:$0xff]  ;;  %v5374_v33 = vpack.c.bf16 %v3928_v26, %v3927_v53  ;;  %v4000_v53 = vld [vmem:[%s6691_s7 + $0x298] sm:$0xff] }
0x1a4f   :  { %v3550_v48 = vadd.f32 %v4441_v45, %v3544_v37  ;;  %v3938_v45 = vld [vmem:[%s6691_s7 + $0xa8] sm:$0xff]  ;;  %v5384_v37 = vpack.c.bf16 %v3966_v39, %v3965_v36  ;;  %v3976_v36 = vld [vmem:[%s6691_s7 + $0x1d8] sm:$0xff]  ;;  %v3929_v39 = vld [vmem:[%s6691_s7 + $0x60] sm:$0xff] }
0x1a50   :  { %v3559_v49 = vrot.slane %v3551_v47, 7  ;;  %v3949_v47 = vld [vmem:[%s6691_s7 + $0x100] sm:$0xff]  ;;  %v5360_v54 = vpack.c.bf16 %v3938_v45, %v3937_v44  ;;  %v3959_v44 = vld [vmem:[%s6691_s7 + $0x150] sm:$0xff]  ;;  %v3960_v45 = vld [vmem:[%s6691_s7 + $0x158] sm:$0xff] }
0x1a52   :  { %v3561_v27 = vsel %vm3560_vm8, %v3559_v49, %v3550_v48  ;;  %v3950_v48 = vld [vmem:[%s6691_s7 + $0x108] sm:$0xff]  ;;  %v5358_v49 = vpack.c.bf16 %v3920_v43, %v3919_v41 }
0x1a53   :  { %5096 = vmatmul.mubr.msk.f32.vlgmr.msra.gmra.mrb[40].mxu1 %vm149_vm2, %v3561_v27  ;;  %v3967_v27 = vld [vmem:[%s6691_s7 + $0x190] sm:$0xff]  ;;  %v5386_v59 = vpack.c.bf16 %v3950_v48, %v3949_v47  ;;  %v3978_v47 = vld [vmem:[%s6691_s7 + $0x1e8] sm:$0xff]  ;;  %v5406_v48 = vpack.c.bf16 %v3960_v45, %v3959_v44  ;;  %v3985_v44 = vld [vmem:[%s6691_s7 + $0x220] sm:$0xff] }
0x1a54   :  { %3832 = vmatprep.mubr.f32.mxu1 %v5548_v22  ;;  %5339 = vmatpush1.bf16.msra.mxu1 %v5338_v55  ;;  %v3970_v55 = vld [vmem:[%s6691_s7 + $0x1a8] sm:$0xff] }
0x1a55   :  { %5341 = vmatprep.subr.bf16.mxu1 %v5340_v51  ;;  %v5392_v5 = vpack.c.bf16 %v3970_v55, %v3969_v62  ;;  %v3954_v51 = vld [vmem:[%s6691_s7 + $0x128] sm:$0xff]  ;;  %v3964_v62 = vld [vmem:[%s6691_s7 + $0x178] sm:$0xff] }
0x1a56   :  { %v3986_v45 = vld [vmem:[%s6691_s7 + $0x228] sm:$0xff] }
0x1a58   :  { %5343 = vmatpush1.bf16.msra.mxu1 %v5342_v9  ;;  %v5368_v9 = vpack.c.bf16 %v3942_v3, %v3941_v2  ;;  %v5416_v2 = vpack.c.bf16 %v3998_v1, %v3997_v0  ;;  %v4443_v3 = vld [vmem:[%s6690_s6 + $0xe0] ss:$8 sm:$0xf] }
0x1a59   :  { %5353 = vmatprep.subr.bf16.mxu1 %v5352_v16  ;;  %v5394_v16 = vpack.c.bf16 %v3954_v51, %v3953_v6  ;;  %v3674_v6 = vsub.s32 2, %v5750_v42  ;;  %v3670_v51 = vsub.s32 1, %v5750_v42  ;;  %v4009_v0 = vld [vmem:[%s6691_s7 + $0x2e0] sm:$0xff]  ;;  %v4010_v1 = vld [vmem:[%s6691_s7 + $0x2e8] sm:$0xff] }
0x1b26   :  { %v3630_v18 = vpop.f32.mrb[40].mxu1 }
0x1b27   :  { %v3631_v19 = vadd.f32 %v3630_v18, %v3556_v17  ;;  %v5097_v21 = vpop.f32.mrb[41].mxu1  ;;  %v5396_v17 = vpack.c.bf16 %v3972_v8, %v3971_v7  ;;  %v3955_v18 = vld [vmem:[%s6691_s7 + $0x130] sm:$0xff] }
0x1b28   :  { %v5370_v21 = vpack.c.bf16 %v3926_v11, %v3925_v10 }
0x1b29   :  { %5520 = vtanh.f32 %v3631_v19  ;;  %v3956_v19 = vld [vmem:[%s6691_s7 + $0x138] sm:$0xff] }
0x1b2a   :  { %v5398_v52 = vpack.c.bf16 %v3956_v19, %v3955_v18  ;;  %v3981_v19 = vld [vmem:[%s6691_s7 + $0x200] sm:$0xff] }
0x1b33   :  { %v5521_v38 = vpop.eup %5520 }
0x1b34   :  { %4445 = vmatmul.mubr.msk.f32.vlgmr.msra.gmra.mrb[30].mxu0 %vm149_vm2, %v5521_v38  ;;  %4446 = vmatmul.mubr.msk.f32.vlgmr.msra.gmra.mrb[42].mxu1 %vm149_vm2, %v5521_v38 }
0x1b35   :  { %5347 = vmatpush1.bf16.msra.mxu0 %v5346_v30  ;;  %3903 = vmatprep.mubr.f32.mxu0 %v5548_v22  ;;  %v3968_v22 = vld [vmem:[%s6691_s7 + $0x198] sm:$0xff]  ;;  %v5400_v30 = vpack.c.bf16 %v3974_v24, %v3973_v23  ;;  %v3686_v24 = vsub.s32 5, %v5750_v42 }
0x1b36   :  { %5349 = vmatprep.subr.bf16.mxu0 %v5348_v31  ;;  %5355 = vmatpush3.bf16.msra.mxu1 %v5354_v34  ;;  %v5388_v60 = vpack.c.bf16 %v3968_v22, %v3967_v27  ;;  %v3957_v31 = vld [vmem:[%s6691_s7 + $0x140] sm:$0xff]  ;;  %v3975_v34 = vld [vmem:[%s6691_s7 + $0x1d0] sm:$0xff]  ;;  %v3962_v22 = vld [vmem:[%s6691_s7 + $0x168] sm:$0xff] }
0x1b37   :  { %5357 = vmatprep.subr.bf16.mxu1 %v5356_v40  ;;  %v3930_v40 = vld [vmem:[%s6691_s7 + $0x68] sm:$0xff]  ;;  %v5402_v41 = vpack.c.bf16 %v3958_v32, %v3957_v31  ;;  %v5404_v43 = vpack.c.bf16 %v3976_v36, %v3975_v34  ;;  %v3961_v27 = vld [vmem:[%s6691_s7 + $0x160] sm:$0xff]  ;;  %v3983_v32 = vld [vmem:[%s6691_s7 + $0x210] sm:$0xff] }
0x1b38   :  { %v4001_v36 = vld [vmem:[%s6691_s7 + $0x2a0] sm:$0xff] }
0x1b39   :  { %5351 = vmatpush1.bf16.msra.mxu0 %v5350_v46  ;;  %v5378_v46 = vpack.c.bf16 %v3930_v40, %v3929_v39 }
0x1b3a   :  { %5385 = vmatprep.subr.bf16.mxu0 %v5384_v37  ;;  %5359 = vmatpush3.bf16.msra.mxu1 %v5358_v49  ;;  %v3977_v37 = vld [vmem:[%s6691_s7 + $0x1e0] sm:$0xff] }
0x1b3b   :  { %5361 = vmatprep.subr.bf16.mxu1 %v5360_v54  ;;  %v5408_v49 = vpack.c.bf16 %v3978_v47, %v3977_v37  ;;  %v5410_v54 = vpack.c.bf16 %v3962_v22, %v3961_v27  ;;  %v4003_v37 = vld [vmem:[%s6691_s7 + $0x2b0] sm:$0xff]  ;;  %v4004_v47 = vld [vmem:[%s6691_s7 + $0x2b8] sm:$0xff] }
0x1b3c   :  { %4447 = vmatmul.mubr.msk.f32.vlgmr.msra.gmra.mrb[32].mxu0 %vm149_vm2, %v5521_v38  ;;  %v5376_v38 = vpack.c.bf16 %v3946_v29, %v3945_v28  ;;  %v5428_v27 = vpack.c.bf16 %v4004_v47, %v4003_v37  ;;  %v3987_v22 = vld [vmem:[%s6691_s7 + $0x230] sm:$0xff] }
0x1b3d   :  { %5387 = vmatpush3.bf16.msra.mxu0 %v5386_v59  ;;  %v3932_v59 = vld [vmem:[%s6691_s7 + $0x78] sm:$0xff] }
0x1b3e   :  { %5389 = vmatprep.subr.bf16.mxu0 %v5388_v60  ;;  %5363 = vmatpush3.bf16.msra.mxu1 %v5362_v13  ;;  %v3979_v60 = vld [vmem:[%s6691_s7 + $0x1f0] sm:$0xff]  ;;  %v5382_v56 = vpack.c.bf16 %v3932_v59, %v3931_v15  ;;  %v5432_v15 = vpack.c.bf16 %v4006_v58, %v4005_v57  ;;  %v3989_v59 = vld [vmem:[%s6691_s7 + $0x240] sm:$0xff] }
0x1b3f   :  { %5365 = vmatprep.subr.bf16.mxu1 %v5364_v63  ;;  %v3963_v13 = vld [vmem:[%s6691_s7 + $0x170] sm:$0xff]  ;;  %v5412_v55 = vpack.c.bf16 %v3980_v61, %v3979_v60  ;;  %v3990_v60 = vld [vmem:[%s6691_s7 + $0x248] sm:$0xff]  ;;  %v4008_v61 = vld [vmem:[%s6691_s7 + $0x2d8] sm:$0xff] }
0x1b40   :  { %v5414_v63 = vpack.c.bf16 %v3964_v62, %v3963_v13  ;;  %v5434_v13 = vpack.c.bf16 %v3990_v60, %v3989_v59 }
0x1b41   :  { %5391 = vmatpush3.bf16.msra.mxu0 %v5390_v4  ;;  %v4444_v4 = vld [vmem:[%s6690_s6 + $0xe0] ss:$8 sm:$0x30] }
0x1b42   :  { %5393 = vmatprep.subr.bf16.mxu0 %v5392_v5  ;;  %5367 = vmatpush3.bf16.msra.mxu1 %v5366_v35  ;;  %v6565_v5 = vor.u32 %v4444_v4, %v4443_v3  ;;  %v3678_v35 = vsub.s32 3, %v5750_v42  ;;  %v3682_v3 = vsub.s32 4, %v5750_v42  ;;  %v5440_v4 = vpack.c.bf16 %v4010_v1, %v4009_v0 }
0x1b43   :  { %5369 = vmatprep.subr.bf16.mxu1 %v5368_v9 }
0x1b44   :  { %v3667_v7 = vrot.slane %v6565_v5, %v5754_v50  ;;  %v3675_v8 = vrot.slane %v6565_v5, %v3674_v6  ;;  %v3671_v9 = vrot.slane %v6565_v5, %v3670_v51  ;;  %v3679_v10 = vrot.slane %v6565_v5, %v3678_v35  ;;  %v3982_v50 = vld [vmem:[%s6691_s7 + $0x208] sm:$0xff]  ;;  %v3993_v6 = vld [vmem:[%s6691_s7 + $0x260] sm:$0xff]  ;;  %v4011_v35 = vld [vmem:[%s6691_s7 + $0x2f0] sm:$0xff] }
0x1b45   :  { %5395 = vmatpush3.bf16.msra.mxu0 %v5394_v16  ;;  %v5418_v29 = vpack.c.bf16 %v3982_v50, %v3981_v19  ;;  %v3687_v34 = vrot.slane %v6565_v5, %v3686_v24  ;;  %v3994_v51 = vld [vmem:[%s6691_s7 + $0x268] sm:$0xff] }
0x1b46   :  { %5397 = vmatprep.subr.bf16.mxu0 %v5396_v17  ;;  %5371 = vmatpush3.bf16.msra.mxu1 %v5370_v21  ;;  %v5442_v42 = vpack.c.bf16 %v3994_v51, %v3993_v6 }
0x1b47   :  { %5373 = vmatprep.subr.bf16.mxu1 %v5372_v25  ;;  %v3999_v25 = vld [vmem:[%s6691_s7 + $0x290] sm:$0xff] }
0x1b48   :  { %v5420_v31 = vpack.c.bf16 %v4000_v53, %v3999_v25 }
0x1b49   :  { %5399 = vmatpush3.bf16.msra.mxu0 %v5398_v52 }
0x1b4a   :  { %5401 = vmatprep.subr.bf16.mxu0 %v5400_v30  ;;  %5375 = vmatpush3.bf16.msra.mxu1 %v5374_v33  ;;  %v3984_v33 = vld [vmem:[%s6691_s7 + $0x218] sm:$0xff] }
0x1b4b   :  { %5377 = vmatprep.subr.bf16.mxu1 %v5376_v38  ;;  %v4002_v38 = vld [vmem:[%s6691_s7 + $0x2a8] sm:$0xff]  ;;  %v5422_v40 = vpack.c.bf16 %v3984_v33, %v3983_v32 }
0x1b4d   :  { %5403 = vmatpush3.bf16.msra.mxu0 %v5402_v41 }
0x1b4e   :  { %5405 = vmatprep.subr.bf16.mxu0 %v5404_v43  ;;  %5379 = vmatpush3.bf16.msra.mxu1 %v5378_v46  ;;  %v5424_v43 = vpack.c.bf16 %v4002_v38, %v4001_v36 }
0x1b4f   :  { %5381 = vmatprep.subr.bf16.mxu1 %v5380_v20 }
0x1b51   :  { %5407 = vmatpush3.bf16.msra.mxu0 %v5406_v48 }
0x1b52   :  { %5409 = vmatprep.subr.bf16.mxu0 %v5408_v49  ;;  %5383 = vmatpush3.bf16.msra.mxu1 %v5382_v56  ;;  %v5426_v49 = vpack.c.bf16 %v3986_v45, %v3985_v44  ;;  %v4007_v56 = vld [vmem:[%s6691_s7 + $0x2d0] sm:$0xff] }
0x1b53   :  { %5417 = vmatprep.subr.bf16.mxu1 %v5416_v2  ;;  %v5436_v62 = vpack.c.bf16 %v4008_v61, %v4007_v56 }
0x1b55   :  { %5411 = vmatpush3.bf16.msra.mxu0 %v5410_v54  ;;  %v3988_v54 = vld [vmem:[%s6691_s7 + $0x238] sm:$0xff] }
0x1b56   :  { %5413 = vmatprep.subr.bf16.mxu0 %v5412_v55  ;;  %v5430_v20 = vpack.c.bf16 %v3988_v54, %v3987_v22  ;;  %v3991_v55 = vld [vmem:[%s6691_s7 + $0x250] sm:$0xff] }
0x1b59   :  { %5415 = vmatpush3.bf16.msra.mxu0 %v5414_v63  ;;  %v3992_v63 = vld [vmem:[%s6691_s7 + $0x258] sm:$0xff] }
0x1b5a   :  { %v5438_v2 = vpack.c.bf16 %v3992_v63, %v3991_v55 }
0x1c07   :  { %v3763_v11 = vpop.f32.mrb[30].mxu0  ;;  %v3834_v12 = vpop.f32.mrb[42].mxu1 }
0x1c08   :  { %v3764_v14 = vadd.f32 %v3763_v11, %v3667_v7  ;;  %v3835_v16 = vadd.f32 %v3834_v12, %v3675_v8  ;;  %v3765_v17 = vpop.f32.mrb[31].mxu0  ;;  %v3836_v18 = vpop.f32.mrb[43].mxu1  ;;  %v4012_v7 = vld [vmem:[%s6691_s7 + $0x2f8] sm:$0xff]  ;;  %v3683_v8 = vrot.slane %v6565_v5, %v3682_v3  ;;  %v3916_v5 = vld [vmem:[%s6690_s6 + $0xe2] ss:$0 sm:$0xff] }
0x1c09   :  { %v3766_v21 = vadd.f32 %v3765_v17, %v3671_v9  ;;  %v3837_v23 = vadd.f32 %v3836_v18, %v3679_v10  ;;  %v5444_v9 = vpack.c.bf16 %v4012_v7, %v4011_v35  ;;  %v3995_v10 = vld [vmem:[%s6691_s7 + $0x270] sm:$0xff]  ;;  %v3996_v11 = vld [vmem:[%s6691_s7 + $0x278] sm:$0xff]  ;;  %s5552_s7 = smov [#allocation2]  }
0x1c0a   :  { %v3910_v52 = vmax.f32 %v3764_v14, 0.0  ;;  %v3912_v30 = vmax.f32 %v3835_v16, 0.0  ;;  %v5446_v12 = vpack.c.bf16 %v3996_v11, %v3995_v10  ;;  %s4231_s30 = sshll.u32 %s5552_s7, 4  ;;  %s4232_s30 = int_to_ptr.vmem [resolvable:$true] %s4231_s30 }
0x1c0b   :  { %v3911_v26 = vmax.f32 %v3766_v21, 0.0  ;;  %v3913_v28 = vmax.f32 %v3837_v23, 0.0  ;;  %s5522_s9 = scalar_lea.vmem %s4232_s30, 32  ;;  %p5527_p1 = scmp.lt.s32.totalorder %s4232_s30, %s4232_s30 }
0x1c0c   :  { %p5523_p0 = scmp.ne.s32.totalorder %s4232_s30, %s5522_s9  ;;  %p5528_p2 = scmp.lt.s32.totalorder %s5522_s9, %s5522_s9 }
0x1c0d   :  { %4077 = vmatprep.mubr.f32.mxu1 %v3911_v26  ;;  %4147 = vmatprep.mubr.f32.mxu0 %v3913_v28 }
0x1c0e   :  { %4078 = vmatmul.mubr.f32.vlgmr.msra.gmra.mrb[44].mxu1 %v3910_v52  ;;  %4148 = vmatmul.mubr.f32.vlgmr.msra.gmra.mrb[34].mxu0 %v3912_v30  ;;  %p5529_p3 = por %p5528_p2, %p5527_p1 }
0x1c0f   :  { %v3905_v39 = vpop.f32.mrb[32].mxu0  ;;  %5419 = vmatpush3.bf16.msra.mxu1 %v5418_v29 }
0x1c10   :  { %v3907_v41 = vpop.f32.mrb[33].mxu0  ;;  %5421 = vmatprep.subr.bf16.mxu1 %v5420_v31  ;;  %v3906_v14 = vadd.f32 %v3905_v39, %v3683_v8  ;;  %p5530_p4 = pnand %p5529_p3, %p5523_p0 }
0x1c11   :  { %v3908_v46 = vadd.f32 %v3907_v41, %v3687_v34 }
0x1c12   :  { %v3914_v16 = vmax.f32 %v3906_v14, 0.0 }
0x1c13   :  { %v3915_v48 = vmax.f32 %v3908_v46, 0.0  ;;  %5423 = vmatpush3.bf16.msra.mxu1 %v5422_v40 }
0x1c14   :  { %5425 = vmatprep.subr.bf16.mxu1 %v5424_v43 }
0x1c15   :  { %4217 = vmatprep.mubr.f32.mxu1 %v3915_v48 }
0x1c17   :  { %5427 = vmatpush3.bf16.msra.mxu1 %v5426_v49 }
0x1c18   :  { %5429 = vmatprep.subr.bf16.mxu1 %v5428_v27 }
0x1c1b   :  { %5431 = vmatpush3.bf16.msra.mxu1 %v5430_v20 }
0x1c1c   :  { %5433 = vmatprep.subr.bf16.mxu1 %v5432_v15 }
0x1c1f   :  { %5435 = vmatpush3.bf16.msra.mxu1 %v5434_v13 }
0x1c20   :  { %5437 = vmatprep.subr.bf16.mxu1 %v5436_v62 }
0x1c23   :  { %5439 = vmatpush3.bf16.msra.mxu1 %v5438_v2 }
0x1c24   :  { %5441 = vmatprep.subr.bf16.mxu1 %v5440_v4 }
0x1c27   :  { %5443 = vmatpush3.bf16.msra.mxu1 %v5442_v42 }
0x1c28   :  { %5445 = vmatprep.subr.bf16.mxu1 %v5444_v9 }
0x1c2b   :  { %5447 = vmatpush3.bf16.msra.mxu1 %v5446_v12 }
0x1c2e   :  { %4218 = vmatmul.mubr.f32.vlgmr.msra.gmra.mrb[46].mxu1 %v3914_v16 }
0x1ce1   :  { %v4663_v17 = vpop.f32.mrb[44].mxu1  ;;  %v4698_v18 = vpop.f32.mrb[34].mxu0 }
0x1ce2   :  { %v4664_v19 = vpop.f32.mrb[45].mxu1  ;;  %v4699_v50 = vpop.f32.mrb[35].mxu0 }
0x1ce3   :  { %v4665_v21 = vadd.f32 %v4664_v19, %v4663_v17  ;;  %v4700_v23 = vadd.f32 %v4699_v50, %v4698_v18 }
0x1ce5   :  { %v4080_v24 = vadd.f32 %v4665_v21, %v3916_v5 }
0x1ce7   :  { %v4150_v25 = vadd.f32 %v4700_v23, %v4080_v24 }
0x1d01   :  { %v4733_v53 = vpop.f32.mrb[46].mxu1 }
0x1d02   :  { %v4734_v26 = vpop.f32.mrb[47].mxu1 }
0x1d03   :  { %v4735_v28 = vadd.f32 %v4734_v26, %v4733_v53 }
0x1d05   :  { %v4220_v29 = vadd.f32 %v4735_v28, %v4150_v25 }
0x1d07   :  { %4224 = vst.msk [vmem:[#allocation2] sm:$0x3] %vm4223_vm9, %v4220_v29 }
0x1d08   :  { %5533 = shalt.err (!%p5530_p4)
}
0x1d09   :  { %s5534_s1 = scalar_lea.hbm %s6692_s8, 32 }
0x1d0a   :  { %p5535_p5 = scmp.ne.s32.totalorder %s6692_s8, %s5534_s1  ;;  %p5538_p6 = scmp.lt.u32.totalorder %s5534_s1, %s6692_s8 }
0x1d0c   :  { %p5540_p7 = pnand %p5538_p6, %p5535_p5 }
0x1d0e   :  { %5543 = shalt.err (!%p5540_p7)
}
0x1d0f   :  { %4234 = dma.vmem_to_hbm [thread:$0]  %s4232_s30, 32, %s6692_s8, [#allocation3]  }
0x1d10   :  { %5544 = dma.done.wait [#allocation3], 32  }
0x1d11   :  { %5545 = vsyncadd [#allocation3], 4294967264 }
0x1d12   :  { %4238 = vsyncpa [#allocation3], 1 }

</bundles_post_ra>
